<compile_context>
chip_gen: v5e
topology: v5e:2x2
jax: 0.10.0
libtpu: 0.0.40
codegen_flags: <defaults>
</compile_context>

<pallas_src>
import functools

import jax
import jax.numpy as jnp
from jax.experimental import pallas as pl
from jax.experimental.pallas import tpu as pltpu

D_IN, D_H1, D_H2, D_OUT = 439, 900, 100, 2


def _mlp_kernel(x_ref, w1_ref, b1_ref, w2_ref, b2_ref, w3_ref, b3_ref, o_ref):
    # Matmuls in bf16 on the MXU, accumulate in f32; elementwise ops in f32.
    x = x_ref[...].astype(jnp.bfloat16)

    h1 = jnp.dot(x, w1_ref[...], preferred_element_type=jnp.float32) + b1_ref[...]
    h1 = jnp.maximum(h1, 0.0)                                   # ReLU

    h2 = jnp.dot(h1.astype(jnp.bfloat16), w2_ref[...],
                 preferred_element_type=jnp.float32) + b2_ref[...]
    h2 = jnp.maximum(h2, 0.0)                                   # ReLU

    logits = jnp.dot(h2.astype(jnp.bfloat16), w3_ref[...],
                     preferred_element_type=jnp.float32) + b3_ref[...]
    o_ref[...] = jax.nn.sigmoid(logits)                         # Sigmoid


def _round_up(n, m):
    return ((n + m - 1) // m) * m


@functools.partial(jax.jit, static_argnames=("tile_b",))
def classifier_forward(x, params, *, tile_b=256):
    """x: [batch, 439] float32 -> [batch, 2] float32 (sigmoid probabilities)."""
    w1, b1, w2, b2, w3, b3 = params
    # Store weights in HBM as bf16: halves the DMA bytes; math stays f32-accumulated.
    w1, w2, w3 = (w.astype(jnp.bfloat16) for w in (w1, w2, w3))

    batch = x.shape[0]
    # Tile the batch: multiple of 8 (f32 sublane); cap at 256 which fills the MXU
    # M dimension and keeps per-tile VMEM a few MiB on every generation.
    tb = min(tile_b, _round_up(batch, 8))
    padded = _round_up(batch, tb)
    if padded != batch:
        x = jnp.pad(x, ((0, padded - batch), (0, 0)))

    grid = (padded // tb,)
    const = lambda i: (0, 0)  # weights/biases: same block every step -> stay resident

    in_specs = [
        pl.BlockSpec((tb, D_IN), lambda i: (i, 0)),   # x: tiled over batch
        pl.BlockSpec((D_IN, D_H1), const),            # w1
        pl.BlockSpec((1, D_H1), const),               # b1
        pl.BlockSpec((D_H1, D_H2), const),            # w2
        pl.BlockSpec((1, D_H2), const),               # b2
        pl.BlockSpec((D_H2, D_OUT), const),           # w3
        pl.BlockSpec((1, D_OUT), const),              # b3
    ]
    out_spec = pl.BlockSpec((tb, D_OUT), lambda i: (i, 0))

    mac = D_IN * D_H1 + D_H1 * D_H2 + D_H2 * D_OUT
    cost = pl.CostEstimate(
        flops=2 * padded * mac,
        transcendentals=padded * D_OUT,               # sigmoid exp per logit
        bytes_accessed=(padded * D_IN * 4 + padded * D_OUT * 4
                        + 2 * mac + 4 * (D_H1 + D_H2 + D_OUT)),
    )

    out = pl.pallas_call(
        _mlp_kernel,
        out_shape=jax.ShapeDtypeStruct((padded, D_OUT), jnp.float32),
        grid=grid,
        in_specs=in_specs,
        out_specs=out_spec,
        compiler_params=pltpu.CompilerParams(
            dimension_semantics=("parallel",),        # megacore split on v7x
            vmem_limit_bytes=32 * 1024 * 1024,        # safe on v5e/v6e/v7x
        ),
        cost_estimate=cost,
    )(x, w1, b1, w2, b2, w3, b3)

    return out[:batch]


def init_params(key):
    """PyTorch-style Linear init (U[-1/sqrt(fan_in), 1/sqrt(fan_in)]).

    Weights are stored as (in_features, out_features); biases as (1, out_features)."""
    dims = [(D_IN, D_H1), (D_H1, D_H2), (D_H2, D_OUT)]
    params = []
    for fan_in, fan_out in dims:
        key, kw, kb = jax.random.split(key, 3)
        bound = 1.0 / jnp.sqrt(jnp.float32(fan_in))
        w = jax.random.uniform(kw, (fan_in, fan_out), jnp.float32, -bound, bound)
        b = jax.random.uniform(kb, (1, fan_out), jnp.float32, -bound, bound)
        params.extend([w, b])
    return tuple(params)


def reference_forward(x, params):
    """Plain-JAX f32 reference for correctness checking."""
    w1, b1, w2, b2, w3, b3 = params
    h1 = jnp.maximum(x @ w1 + b1, 0.0)
    h2 = jnp.maximum(h1 @ w2 + b2, 0.0)
    return jax.nn.sigmoid(h2 @ w3 + b3)


if __name__ == "__main__":
    key = jax.random.PRNGKey(0)
    key, kx1, kx2 = jax.random.split(key, 3)
    params = init_params(key)

    ok = True
    # Exercise both an aligned batch and a ragged (non-multiple-of-8) batch.
    for batch, kx in ((8, kx1), (37, kx2)):
        x = jax.random.normal(kx, (batch, D_IN), jnp.float32)
        out = jax.block_until_ready(classifier_forward(x, params))
        ref = reference_forward(x, params)
        assert out.shape == (batch, D_OUT), out.shape
        # bf16 matmul inputs (f32 accumulation) -> allow small absolute slack vs f32 ref.
        ok &= bool(jnp.allclose(out, ref, atol=1e-2, rtol=0.0))

    assert ok, "mismatch vs reference"
    print("KERNEL_OK")
</pallas_src>

<mosaic_0001>
module attributes {stable_mosaic.version = 11 : i64} {
  func.func @_mlp_kernel(%arg0: i32, %arg1: memref<8x439xf32, #tpu.memory_space<vmem>>, %arg2: memref<439x900xbf16, #tpu.memory_space<vmem>>, %arg3: memref<1x900xf32, #tpu.memory_space<vmem>>, %arg4: memref<900x100xbf16, #tpu.memory_space<vmem>>, %arg5: memref<1x100xf32, #tpu.memory_space<vmem>>, %arg6: memref<100x2xbf16, #tpu.memory_space<vmem>>, %arg7: memref<1x2xf32, #tpu.memory_space<vmem>>, %arg8: memref<8x2xf32, #tpu.memory_space<vmem>>) attributes {dimension_semantics = [#tpu.dimension_semantics<parallel>], iteration_bounds = array<i64: 1>, scalar_prefetch = 0 : i64, scratch_operands = 0 : i64, tpu.core_type = #tpu.core_type<tc>, window_params = [{transform_indices = @transform_0, window_bounds = array<i64: 8, 439>}, {pipeline_mode = #tpu.pipeline_mode<synchronous>, transform_indices = @transform_1, window_bounds = array<i64: 439, 900>}, {pipeline_mode = #tpu.pipeline_mode<synchronous>, transform_indices = @transform_2, window_bounds = array<i64: 1, 900>}, {pipeline_mode = #tpu.pipeline_mode<synchronous>, transform_indices = @transform_3, window_bounds = array<i64: 900, 100>}, {pipeline_mode = #tpu.pipeline_mode<synchronous>, transform_indices = @transform_4, window_bounds = array<i64: 1, 100>}, {pipeline_mode = #tpu.pipeline_mode<synchronous>, transform_indices = @transform_5, window_bounds = array<i64: 100, 2>}, {pipeline_mode = #tpu.pipeline_mode<synchronous>, transform_indices = @transform_6, window_bounds = array<i64: 1, 2>}, {transform_indices = @transform_7, window_bounds = array<i64: 8, 2>}]} {
    %c0 = arith.constant 0 : index
    %c0_0 = arith.constant 0 : index
    %0 = vector.load %arg1[%c0, %c0_0] : memref<8x439xf32, #tpu.memory_space<vmem>>, vector<8x439xf32>
    %1 = arith.truncf %0 : vector<8x439xf32> to vector<8x439xbf16>
    %c0_1 = arith.constant 0 : index
    %c0_2 = arith.constant 0 : index
    %2 = vector.load %arg2[%c0_1, %c0_2] : memref<439x900xbf16, #tpu.memory_space<vmem>>, vector<439x900xbf16>
    %cst = arith.constant dense<0.000000e+00> : vector<8x900xf32>
    %3 = tpu.matmul %1, %2, %cst {dimension_numbers = #tpu.dot_dimension_numbers<[1], [0], [0], [1], [0, 0, 1, 1], [], []>} : vector<8x439xbf16>, vector<439x900xbf16>, vector<8x900xf32> -> vector<8x900xf32>
    %c0_3 = arith.constant 0 : index
    %c0_4 = arith.constant 0 : index
    %4 = vector.load %arg3[%c0_3, %c0_4] : memref<1x900xf32, #tpu.memory_space<vmem>>, vector<1x900xf32>
    %5 = vector.broadcast %4 : vector<1x900xf32> to vector<8x900xf32>
    %6 = arith.addf %3, %5 : vector<8x900xf32>
    %cst_5 = arith.constant 0.000000e+00 : f32
    %7 = vector.broadcast %cst_5 : f32 to vector<8x900xf32>
    %8 = arith.maximumf %6, %7 : vector<8x900xf32>
    %9 = arith.truncf %8 : vector<8x900xf32> to vector<8x900xbf16>
    %c0_6 = arith.constant 0 : index
    %c0_7 = arith.constant 0 : index
    %10 = vector.load %arg4[%c0_6, %c0_7] : memref<900x100xbf16, #tpu.memory_space<vmem>>, vector<900x100xbf16>
    %cst_8 = arith.constant dense<0.000000e+00> : vector<8x100xf32>
    %11 = tpu.matmul %9, %10, %cst_8 {dimension_numbers = #tpu.dot_dimension_numbers<[1], [0], [0], [1], [0, 0, 1, 1], [], []>} : vector<8x900xbf16>, vector<900x100xbf16>, vector<8x100xf32> -> vector<8x100xf32>
    %c0_9 = arith.constant 0 : index
    %c0_10 = arith.constant 0 : index
    %12 = vector.load %arg5[%c0_9, %c0_10] : memref<1x100xf32, #tpu.memory_space<vmem>>, vector<1x100xf32>
    %13 = vector.broadcast %12 : vector<1x100xf32> to vector<8x100xf32>
    %14 = arith.addf %11, %13 : vector<8x100xf32>
    %cst_11 = arith.constant 0.000000e+00 : f32
    %15 = vector.broadcast %cst_11 : f32 to vector<8x100xf32>
    %16 = arith.maximumf %14, %15 : vector<8x100xf32>
    %17 = arith.truncf %16 : vector<8x100xf32> to vector<8x100xbf16>
    %c0_12 = arith.constant 0 : index
    %c0_13 = arith.constant 0 : index
    %18 = vector.load %arg6[%c0_12, %c0_13] : memref<100x2xbf16, #tpu.memory_space<vmem>>, vector<100x2xbf16>
    %cst_14 = arith.constant dense<0.000000e+00> : vector<8x2xf32>
    %19 = tpu.matmul %17, %18, %cst_14 {dimension_numbers = #tpu.dot_dimension_numbers<[1], [0], [0], [1], [0, 0, 1, 1], [], []>} : vector<8x100xbf16>, vector<100x2xbf16>, vector<8x2xf32> -> vector<8x2xf32>
    %c0_15 = arith.constant 0 : index
    %c0_16 = arith.constant 0 : index
    %20 = vector.load %arg7[%c0_15, %c0_16] : memref<1x2xf32, #tpu.memory_space<vmem>>, vector<1x2xf32>
    %21 = vector.broadcast %20 : vector<1x2xf32> to vector<8x2xf32>
    %22 = arith.addf %19, %21 : vector<8x2xf32>
    %23 = arith.negf %22 : vector<8x2xf32>
    %24 = math.exp %23 : vector<8x2xf32>
    %cst_17 = arith.constant 1.000000e+00 : f32
    %25 = vector.broadcast %cst_17 : f32 to vector<8x2xf32>
    %26 = arith.addf %25, %24 : vector<8x2xf32>
    %27 = arith.divf %25, %26 : vector<8x2xf32>
    %c0_18 = arith.constant 0 : index
    %c0_19 = arith.constant 0 : index
    %28 = vector.load %arg8[%c0_18, %c0_19] : memref<8x2xf32, #tpu.memory_space<vmem>>, vector<8x2xf32>
    tpu.vector_store %arg8[%c0_18, %c0_19], %27 {strides = array<i32>} : memref<8x2xf32, #tpu.memory_space<vmem>>, vector<8x2xf32>,
    return
  }
  func.func @transform_0(%arg0: i32) -> (i32, i32) {
    %c0_i32 = arith.constant 0 : i32
    %c0_i32_0 = arith.constant 0 : i32
    return %arg0, %c0_i32 : i32, i32
  }
  func.func @transform_1(%arg0: i32) -> (i32, i32) {
    %c0_i32 = arith.constant 0 : i32
    %c0_i32_0 = arith.constant 0 : i32
    %c0_i32_1 = arith.constant 0 : i32
    return %c0_i32, %c0_i32_0 : i32, i32
  }
  func.func @transform_2(%arg0: i32) -> (i32, i32) {
    %c0_i32 = arith.constant 0 : i32
    %c0_i32_0 = arith.constant 0 : i32
    %c0_i32_1 = arith.constant 0 : i32
    return %c0_i32, %c0_i32_0 : i32, i32
  }
  func.func @transform_3(%arg0: i32) -> (i32, i32) {
    %c0_i32 = arith.constant 0 : i32
    %c0_i32_0 = arith.constant 0 : i32
    %c0_i32_1 = arith.constant 0 : i32
    return %c0_i32, %c0_i32_0 : i32, i32
  }
  func.func @transform_4(%arg0: i32) -> (i32, i32) {
    %c0_i32 = arith.constant 0 : i32
    %c0_i32_0 = arith.constant 0 : i32
    %c0_i32_1 = arith.constant 0 : i32
    return %c0_i32, %c0_i32_0 : i32, i32
  }
  func.func @transform_5(%arg0: i32) -> (i32, i32) {
    %c0_i32 = arith.constant 0 : i32
    %c0_i32_0 = arith.constant 0 : i32
    %c0_i32_1 = arith.constant 0 : i32
    return %c0_i32, %c0_i32_0 : i32, i32
  }
  func.func @transform_6(%arg0: i32) -> (i32, i32) {
    %c0_i32 = arith.constant 0 : i32
    %c0_i32_0 = arith.constant 0 : i32
    %c0_i32_1 = arith.constant 0 : i32
    return %c0_i32, %c0_i32_0 : i32, i32
  }
  func.func @transform_7(%arg0: i32) -> (i32, i32) {
    %c0_i32 = arith.constant 0 : i32
    %c0_i32_0 = arith.constant 0 : i32
    return %arg0, %c0_i32 : i32, i32
  }
}

</mosaic_0001>

<bundles_post_ra>
// kernel: classifier_forward.1
= control target key start
LH: loop header
LB: loop body
LE: loop exit
PB: predicated region body
PF: predicated region fallthrough
CT: control target
= control target key end

     0   :  { %vm1377_vm0 = vcmask 1042432   ;;  %vm1378_vm1 = vcmask 1043456   ;;  %v3916_v19 = vmov 65535   ;;  %vm1373_vm2 = vcmask 449536   ;;  %s5596_s1 = inlined_call_operand.vmem [shape: bf16[439,900], index: 1, kind: input, shape index: {}]   ;;  %s5597_s0 = inlined_call_operand.vmem [shape: f32[8,439], index: 0, kind: input, shape index: {}]   ;;  %s5598_s3 = inlined_call_operand.vmem [shape: bf16[900,100], index: 3, kind: input, shape index: {}]   ;;  %s5599_s2 = inlined_call_operand.vmem [shape: f32[1,900], index: 2, kind: input, shape index: {}]   ;;  %s5600_s4 = inlined_call_operand.vmem [shape: f32[1,100], index: 4, kind: input, shape index: {}]   ;;  %s5601_s6 = inlined_call_operand.vmem [shape: f32[1,2], index: 6, kind: input, shape index: {}]   ;;  %s5602_s5 = inlined_call_operand.vmem [shape: bf16[100,2], index: 5, kind: input, shape index: {}]   ;;  %s5603_s7 = inlined_call_operand.vmem [shape: f32[8,2], index: 7, kind: output, shape index: {}]  }
   0x1   :  { %v2734_v0 = vld [vmem:[%s5596_s1 + $0x1c0] sm:$0xf]  ;;  %v1379_v20 = vsel %vm1377_vm0, 4294967295, %v3916_v19  ;;  %v3687_v60 = vld [vmem:[%s5596_s1 + $0x1c4] sm:$0xf]  ;;  %vm2297_vm3 = vcmask 1041408  }
   0x2   :  { %v3691_v1 = vld [vmem:[%s5596_s1 + $0x1dc] sm:$0xf0]  ;;  %v4013_v26 = vsel %vm1378_vm1, %v1379_v20, 0  ;;  %v2736_v63 = vld [vmem:[%s5596_s1 + $0x1e0] sm:$0xf0]  ;;  %vm2293_vm4 = vcmask 31744  }
   0x3   :  { %v2990_v2 = vld [vmem:[%s5596_s1 + $0x3c0] sm:$0xf]  ;;  %v2735_v3 = vor.u32 %v3691_v1, %v2734_v0  ;;  %v3671_v20 = vld [vmem:[%s5596_s1 + $0x144] sm:$0xf]  ;;  %vm2463_vm5 = vcmask 818176   ;;  %vm2502_vm9 = vcmask 15360  }
   0x4   :  { %v3755_v4 = vld [vmem:[%s5596_s1 + $0x3dc] sm:$0xf0] }
   0x5   :  { %v3246_v5 = vld [vmem:[%s5596_s1 + $0x5c0] sm:$0xf]  ;;  %v2991_v7 = vor.u32 %v3755_v4, %v2990_v2  ;;  %1405 = vmatpush.bf16.msra.mxu0 %v2735_v3 }
   0x6   :  { %v3819_v6 = vld [vmem:[%s5596_s1 + $0x5dc] sm:$0xf0] }
   0x7   :  { %v3247_v8 = vor.u32 %v3819_v6, %v3246_v5  ;;  %v2702_v9 = vld [vmem:[%s5596_s1 + $0x180] sm:$0xf]  ;;  %1418 = vmatpush.bf16.msra.mxu1 %v2991_v7  ;;  %v2739_v6 = vor.u32 %v3687_v60, %v2736_v63  ;;  %v2928_v60 = vld [vmem:[%s5596_s1 + $0x360] sm:$0xf0] }
   0x8   :  { %v3683_v10 = vld [vmem:[%s5596_s1 + $0x19c] sm:$0xf0]  ;;  %v3799_v63 = vld [vmem:[%s5596_s1 + $0x544] sm:$0xf] }
   0x9   :  { %v2958_v11 = vld [vmem:[%s5596_s1 + $0x380] sm:$0xf]  ;;  %v2703_v12 = vor.u32 %v3683_v10, %v2702_v9  ;;  %1431 = vmatpush.bf16.msra.mxu2 %v3247_v8  ;;  %v3679_v8 = vld [vmem:[%s5596_s1 + $0x184] sm:$0xf] }
   0xa   :  { %v3747_v13 = vld [vmem:[%s5596_s1 + $0x39c] sm:$0xf0] }
   0xb   :  { %v3214_v14 = vld [vmem:[%s5596_s1 + $0x580] sm:$0xf]  ;;  %v2959_v16 = vor.u32 %v3747_v13, %v2958_v11  ;;  %1406 = vmatpush.bf16.msra.mxu0 %v2703_v12  ;;  %v2704_v12 = vld [vmem:[%s5596_s1 + $0x1a0] sm:$0xf0] }
   0xc   :  { %v3811_v15 = vld [vmem:[%s5596_s1 + $0x59c] sm:$0xf0] }
   0xd   :  { %v3215_v17 = vor.u32 %v3811_v15, %v3214_v14  ;;  %v3996_v18 = vld [vmem:[%s5596_s1 + $0x6c0] sm:$0xff]  ;;  %1419 = vmatpush.bf16.msra.mxu1 %v2959_v16 }
   0xe   :  { %v2670_v21 = vld [vmem:[%s5596_s1 + $0x140] sm:$0xf]  ;;  %v925_v23 = vunpack.c.l.b16 %v3996_v18 }
   0xf   :  { %v3675_v22 = vld [vmem:[%s5596_s1 + $0x15c] sm:$0xf0]  ;;  %1432 = vmatpush.bf16.msra.mxu2 %v3215_v17  ;;  %v926_v17 = vunpack.c.h.b16 %v3996_v18 }
  0x10   :  { %v2926_v24 = vld [vmem:[%s5596_s1 + $0x340] sm:$0xf]  ;;  %v1149_v29 = vpack.c.b16 %v925_v23, %v925_v23  ;;  %v2671_v30 = vor.u32 %v3675_v22, %v2670_v21  ;;  %v2707_v21 = vor.u32 %v3679_v8, %v2704_v12  ;;  %v2672_v23 = vld [vmem:[%s5596_s1 + $0x160] sm:$0xf0] }
  0x11   :  { %v3739_v25 = vld [vmem:[%s5596_s1 + $0x35c] sm:$0xf0]  ;;  %v3647_v8 = vld [vmem:[%s5596_s1 + $0x84] sm:$0xf] }
  0x12   :  { %v3182_v27 = vld [vmem:[%s5596_s1 + $0x540] sm:$0xf]  ;;  %v2927_v33 = vor.u32 %v3739_v25, %v2926_v24  ;;  %v1382_v38 = vand.u32 %v4013_v26, %v1149_v29  ;;  %1407 = vmatpush.bf16.msra.mxu0 %v2671_v30 }
  0x13   :  { %v3803_v28 = vld [vmem:[%s5596_s1 + $0x55c] sm:$0xf0] }
  0x14   :  { %v3342_v31 = vld [vmem:[%s5596_s1 + $0x680] sm:$0xf]  ;;  %v3183_v34 = vor.u32 %v3803_v28, %v3182_v27  ;;  %1448 = vmatpush.bf16.msra.mxu3 %v1382_v38  ;;  %1420 = vmatpush.bf16.msra.mxu1 %v2927_v33  ;;  %v1150_v33 = vpack.c.b16 %v926_v17, %v926_v17  ;;  %v3823_v17 = vld [vmem:[%s5596_s1 + $0x604] sm:$0xf] }
  0x15   :  { %v3843_v32 = vld [vmem:[%s5596_s1 + $0x69c] sm:$0xf0] }
  0x16   :  { %v2638_v35 = vld [vmem:[%s5596_s1 + $0x100] sm:$0xf]  ;;  %v3343_v42 = vor.u32 %v3843_v32, %v3342_v31  ;;  %1433 = vmatpush.bf16.msra.mxu2 %v3183_v34  ;;  %v3751_v31 = vld [vmem:[%s5596_s1 + $0x3c4] sm:$0xf] }
  0x17   :  { %v3667_v36 = vld [vmem:[%s5596_s1 + $0x11c] sm:$0xf0]  ;;  %v2992_v32 = vld [vmem:[%s5596_s1 + $0x3e0] sm:$0xf0] }
  0x18   :  { %v2894_v37 = vld [vmem:[%s5596_s1 + $0x300] sm:$0xf]  ;;  %v2639_v43 = vor.u32 %v3667_v36, %v2638_v35  ;;  %1449 = vmatpush.bf16.msra.mxu3 %v3343_v42  ;;  %v3815_v35 = vld [vmem:[%s5596_s1 + $0x5c4] sm:$0xf] }
  0x19   :  { %v3731_v39 = vld [vmem:[%s5596_s1 + $0x31c] sm:$0xf0]  ;;  %v3248_v36 = vld [vmem:[%s5596_s1 + $0x5e0] sm:$0xf0] }
  0x1a   :  { %v3150_v40 = vld [vmem:[%s5596_s1 + $0x500] sm:$0xf]  ;;  %v2895_v46 = vor.u32 %v3731_v39, %v2894_v37  ;;  %1408 = vmatpush.bf16.msra.mxu0 %v2639_v43  ;;  %v2675_v37 = vor.u32 %v3671_v20, %v2672_v23  ;;  %v30_v39 = vld [vmem:[%s5597_s0 + $0x18] sm:$0xff]  ;;  %v2640_v42 = vld [vmem:[%s5596_s1 + $0x120] sm:$0xf0]  ;;  %v2995_v43 = vor.u32 %v3751_v31, %v2992_v32 }
  0x1b   :  { %v3795_v41 = vld [vmem:[%s5596_s1 + $0x51c] sm:$0xf0]  ;;  %v3639_v23 = vld [vmem:[%s5596_s1 + $0x44] sm:$0xf] }
  0x1c   :  { %v3310_v44 = vld [vmem:[%s5596_s1 + $0x640] sm:$0xf]  ;;  %v3151_v47 = vor.u32 %v3795_v41, %v3150_v40  ;;  %1421 = vmatpush.bf16.msra.mxu1 %v2895_v46  ;;  %v3663_v41 = vld [vmem:[%s5596_s1 + $0x104] sm:$0xf]  ;;  %v3251_v46 = vor.u32 %v3815_v35, %v3248_v36  ;;  %v3684_v35 = vld [vmem:[%s5596_s1 + $0x1a4] sm:$0xf0] }
  0x1d   :  { %v3835_v45 = vld [vmem:[%s5596_s1 + $0x65c] sm:$0xf0]  ;;  %v3783_v31 = vld [vmem:[%s5596_s1 + $0x4c4] sm:$0xf] }
  0x1e   :  { %v2606_v48 = vld [vmem:[%s5596_s1 + $0xc0] sm:$0xf]  ;;  %v3311_v54 = vor.u32 %v3835_v45, %v3310_v44  ;;  %1434 = vmatpush.bf16.msra.mxu2 %v3151_v47  ;;  %v29_v44 = vld [vmem:[%s5597_s0 + $0x10] sm:$0xff]  ;;  %v4173_v45 = vpack.c.bf16 %v30_v39, %v30_v39  ;;  %v1385_v47 = vand.u32 %v4013_v26, %v1150_v33  ;;  %v3120_v32 = vld [vmem:[%s5596_s1 + $0x4e0] sm:$0xf0] }
  0x1f   :  { %v3659_v49 = vld [vmem:[%s5596_s1 + $0xdc] sm:$0xf0]  ;;  %v3631_v36 = vld [vmem:[%s5596_s1 + $0x4] sm:$0xf]  ;;  %v2998_v39 = vld [vmem:[%s5596_s1 + $0x3c8] sm:$0xf] }
  0x20   :  { %v2862_v50 = vld [vmem:[%s5596_s1 + $0x2c0] sm:$0xf]  ;;  %v2607_v55 = vor.u32 %v3659_v49, %v2606_v48  ;;  %1450 = vmatpush.bf16.msra.mxu3 %v3311_v54  ;;  %v3743_v48 = vld [vmem:[%s5596_s1 + $0x384] sm:$0xf]  ;;  %v2643_v54 = vor.u32 %v3663_v41, %v2640_v42  ;;  %v3756_v41 = vld [vmem:[%s5596_s1 + $0x3e4] sm:$0xf0] }
  0x21   :  { %v3723_v51 = vld [vmem:[%s5596_s1 + $0x2dc] sm:$0xf0]  ;;  %v2960_v49 = vld [vmem:[%s5596_s1 + $0x3a0] sm:$0xf0] }
  0x22   :  { %v3118_v52 = vld [vmem:[%s5596_s1 + $0x4c0] sm:$0xf]  ;;  %v2863_v58 = vor.u32 %v3723_v51, %v2862_v50  ;;  %1409 = vmatpush.bf16.msra.mxu0 %v2607_v55  ;;  %v3807_v50 = vld [vmem:[%s5596_s1 + $0x584] sm:$0xf] }
  0x23   :  { %v3787_v53 = vld [vmem:[%s5596_s1 + $0x4dc] sm:$0xf0]  ;;  %v3216_v51 = vld [vmem:[%s5596_s1 + $0x5a0] sm:$0xf0] }
  0x24   :  { %v3278_v56 = vld [vmem:[%s5596_s1 + $0x600] sm:$0xf]  ;;  %v3119_v59 = vor.u32 %v3787_v53, %v3118_v52  ;;  %1422 = vmatpush.bf16.msra.mxu1 %v2863_v58  ;;  %v3839_v52 = vld [vmem:[%s5596_s1 + $0x684] sm:$0xf]  ;;  %v2963_v58 = vor.u32 %v3743_v48, %v2960_v49  ;;  %v2678_v49 = vld [vmem:[%s5596_s1 + $0x148] sm:$0xf] }
  0x25   :  { %v3827_v57 = vld [vmem:[%s5596_s1 + $0x61c] sm:$0xf0]  ;;  %v3344_v53 = vld [vmem:[%s5596_s1 + $0x6a0] sm:$0xf0] }
  0x26   :  { %v2574_v61 = vld [vmem:[%s5596_s1 + $0x80] sm:$0xf]  ;;  %v3279_v4 = vor.u32 %v3827_v57, %v3278_v56  ;;  %1435 = vmatpush.bf16.msra.mxu2 %v3119_v59  ;;  %v3655_v55 = vld [vmem:[%s5596_s1 + $0xc4] sm:$0xf]  ;;  %v4199_v56 = vpack.c.bf16 %v29_v44, %v29_v44 }
  0x27   :  { %v3651_v62 = vld [vmem:[%s5596_s1 + $0x9c] sm:$0xf0]  ;;  %v2608_v57 = vld [vmem:[%s5596_s1 + $0xe0] sm:$0xf0] }
  0x28   :  { %v2830_v0 = vld [vmem:[%s5596_s1 + $0x280] sm:$0xf]  ;;  %v2575_v5 = vor.u32 %v3651_v62, %v2574_v61  ;;  %1451 = vmatpush.bf16.msra.mxu3 %v3279_v4  ;;  %v3735_v59 = vld [vmem:[%s5596_s1 + $0x344] sm:$0xf]  ;;  %v3219_v61 = vor.u32 %v3807_v50, %v3216_v51  ;;  %v3347_v62 = vor.u32 %v3839_v52, %v3344_v53  ;;  %v3676_v50 = vld [vmem:[%s5596_s1 + $0x164] sm:$0xf0]  ;;  %v2999_v52 = vor.u32 %v3756_v41, %v2998_v39 }
  0x29   :  { %v3715_v1 = vld [vmem:[%s5596_s1 + $0x29c] sm:$0xf0]  ;;  %v3711_v42 = vld [vmem:[%s5596_s1 + $0x284] sm:$0xf]  ;;  %v4322_v51 = vld [vmem:[%s5596_s1 + $0x6c8] sm:$0xff] }
  0x2a   :  { %v3086_v2 = vld [vmem:[%s5596_s1 + $0x480] sm:$0xf]  ;;  %v2831_v7 = vor.u32 %v3715_v1, %v2830_v0  ;;  %1410 = vmatpush.bf16.msra.mxu0 %v2575_v5  ;;  %v3184_v0 = vld [vmem:[%s5596_s1 + $0x560] sm:$0xf0]  ;;  %v28_v5 = vld [vmem:[%s5597_s0 + $0x8] sm:$0xff] }
  0x2b   :  { %v3779_v3 = vld [vmem:[%s5596_s1 + $0x49c] sm:$0xf0]  ;;  %3372 = vmatmul.msk.bf16.vlgmr.msra.gmra.mxu3 %vm1373_vm2, %v4173_v45  ;;  %v3190_v41 = vld [vmem:[%s5596_s1 + $0x548] sm:$0xf] }
  0x2c   :  { %v2542_v9 = vld [vmem:[%s5596_s1 + $0x40] sm:$0xf]  ;;  %v3087_v11 = vor.u32 %v3779_v3, %v3086_v2  ;;  %1457 = vmatpush.bf16.msrb.mxu3 %v2739_v6  ;;  %1423 = vmatpush.bf16.msra.mxu1 %v2831_v7  ;;  %v3831_v2 = vld [vmem:[%s5596_s1 + $0x644] sm:$0xf]  ;;  %v2611_v6 = vor.u32 %v3655_v55, %v2608_v57  ;;  %v4231_v7 = vpack.c.bf16 %v28_v5, %v28_v5  ;;  %v3748_v57 = vld [vmem:[%s5596_s1 + $0x3a4] sm:$0xf0] }
  0x2d   :  { %v3643_v10 = vld [vmem:[%s5596_s1 + $0x5c] sm:$0xf0]  ;;  %v3312_v3 = vld [vmem:[%s5596_s1 + $0x660] sm:$0xf0]  ;;  %v2934_v5 = vld [vmem:[%s5596_s1 + $0x348] sm:$0xf] }
  0x2e   :  { %v2798_v13 = vld [vmem:[%s5596_s1 + $0x240] sm:$0xf]  ;;  %v2543_v19 = vor.u32 %v3643_v10, %v2542_v9  ;;  %1436 = vmatpush.bf16.msra.mxu2 %v3087_v11  ;;  %v2576_v9 = vld [vmem:[%s5596_s1 + $0xa0] sm:$0xf0]  ;;  %v2931_v10 = vor.u32 %v3735_v59, %v2928_v60  ;;  %v3187_v11 = vor.u32 %v3799_v63, %v3184_v0  ;;  %v3315_v12 = vor.u32 %v3831_v2, %v3312_v3  ;;  %v2646_v0 = vld [vmem:[%s5596_s1 + $0x108] sm:$0xf] }
  0x2f   :  { %v3707_v14 = vld [vmem:[%s5596_s1 + $0x25c] sm:$0xf0]  ;;  %v2579_v20 = vor.u32 %v3647_v8, %v2576_v9  ;;  %v2800_v59 = vld [vmem:[%s5596_s1 + $0x260] sm:$0xf0]  ;;  %v2679_v60 = vor.u32 %v3676_v50, %v2678_v49  ;;  %v927_v63 = vunpack.c.l.b16 %v4322_v51  ;;  %v3716_v49 = vld [vmem:[%s5596_s1 + $0x2a4] sm:$0xf0] }
  0x30   :  { %v3054_v15 = vld [vmem:[%s5596_s1 + $0x440] sm:$0xf]  ;;  %v2799_v22 = vor.u32 %v3707_v14, %v2798_v13  ;;  %1411 = vmatpush.bf16.msra.mxu0 %v2543_v19  ;;  %1458 = vmatpush.bf16.msrb.mxu3 %v2707_v21  ;;  %v3727_v13 = vld [vmem:[%s5596_s1 + $0x304] sm:$0xf]  ;;  %v2742_v21 = vld [vmem:[%s5596_s1 + $0x1c8] sm:$0xf] }
  0x31   :  { %v3771_v16 = vld [vmem:[%s5596_s1 + $0x45c] sm:$0xf0]  ;;  %v2896_v14 = vld [vmem:[%s5596_s1 + $0x320] sm:$0xf0] }
  0x32   :  { %v2510_v24 = vld [vmem:[%s5596_s1] sm:$0xf]  ;;  %v3055_v25 = vor.u32 %v3771_v16, %v3054_v15  ;;  %1424 = vmatpush.bf16.msra.mxu1 %v2799_v22  ;;  %v3791_v15 = vld [vmem:[%s5596_s1 + $0x504] sm:$0xf]  ;;  %v3692_v22 = vld [vmem:[%s5596_s1 + $0x1e4] sm:$0xf0] }
  0x33   :  { %v3635_v18 = vld [vmem:[%s5596_s1 + $0x1c] sm:$0xf0]  ;;  %v3152_v16 = vld [vmem:[%s5596_s1 + $0x520] sm:$0xf0] }
  0x34   :  { %v2766_v27 = vld [vmem:[%s5596_s1 + $0x200] sm:$0xf]  ;;  %v2511_v34 = vor.u32 %v3635_v18, %v2510_v24  ;;  %1437 = vmatpush.bf16.msra.mxu2 %v3055_v25  ;;  %1459 = vmatpush.bf16.msrb.mxu3 %v2675_v37  ;;  %v3280_v19 = vld [vmem:[%s5596_s1 + $0x620] sm:$0xf0]  ;;  %v2899_v18 = vor.u32 %v3727_v13, %v2896_v14  ;;  %v3155_v25 = vor.u32 %v3791_v15, %v3152_v16  ;;  %v3254_v14 = vld [vmem:[%s5596_s1 + $0x5c8] sm:$0xf] }
  0x35   :  { %v3699_v28 = vld [vmem:[%s5596_s1 + $0x21c] sm:$0xf0]  ;;  %v2544_v24 = vld [vmem:[%s5596_s1 + $0x60] sm:$0xf0]  ;;  %v3820_v15 = vld [vmem:[%s5596_s1 + $0x5e4] sm:$0xf0]  ;;  %v1151_v16 = vpack.c.b16 %v927_v63, %v927_v63 }
  0x36   :  { %v3022_v29 = vld [vmem:[%s5596_s1 + $0x400] sm:$0xf]  ;;  %v2767_v38 = vor.u32 %v3699_v28, %v2766_v27  ;;  %1412 = vmatpush.bf16.msra.mxu0 %v2511_v34  ;;  %v3283_v27 = vor.u32 %v3823_v17, %v3280_v19  ;;  %v3719_v28 = vld [vmem:[%s5596_s1 + $0x2c4] sm:$0xf]  ;;  %v2547_v33 = vor.u32 %v3639_v23, %v2544_v24  ;;  %v2710_v34 = vld [vmem:[%s5596_s1 + $0x188] sm:$0xf] }
  0x37   :  { %v3763_v30 = vld [vmem:[%s5596_s1 + $0x41c] sm:$0xf0]  ;;  %v2512_v37 = vld [vmem:[%s5596_s1 + $0x20] sm:$0xf0]  ;;  %v2711_v44 = vor.u32 %v3684_v35, %v2710_v34  ;;  %v2614_v17 = vld [vmem:[%s5596_s1 + $0xc8] sm:$0xf] }
  0x38   :  { %v3023_v40 = vor.u32 %v3763_v30, %v3022_v29  ;;  %1425 = vmatpush.bf16.msra.mxu1 %v2767_v38  ;;  %v27_v1 = vld [vmem:[%s5597_s0] sm:$0xff]  ;;  %1460 = vmatpush.bf16.msrb.mxu3 %v2643_v54  ;;  %v2743_v30 = vor.u32 %v3692_v22, %v2742_v21  ;;  %v2515_v48 = vor.u32 %v3631_v36, %v2512_v37  ;;  %v2966_v54 = vld [vmem:[%s5596_s1 + $0x388] sm:$0xf]  ;;  %v2744_v63 = vld [vmem:[%s5596_s1 + $0x1e8] sm:$0xf0] }
  0x39   :  { %v4225_v4 = vpack.c.bf16 %v27_v1, %v27_v1  ;;  %v2864_v29 = vld [vmem:[%s5596_s1 + $0x2e0] sm:$0xf0]  ;;  %v3668_v1 = vld [vmem:[%s5596_s1 + $0x124] sm:$0xf0]  ;;  %v2967_v2 = vor.u32 %v3748_v57, %v2966_v54 }
  0x3a   :  { %1438 = vmatpush.bf16.msra.mxu2 %v3023_v40  ;;  %1470 = vmatpush.bf16.msrb.mxu0 %v2995_v43  ;;  %v2867_v38 = vor.u32 %v3719_v28, %v2864_v29  ;;  %v3123_v40 = vor.u32 %v3783_v31, %v3120_v32  ;;  %v2832_v43 = vld [vmem:[%s5596_s1 + $0x2a0] sm:$0xf0]  ;;  %v3660_v19 = vld [vmem:[%s5596_s1 + $0xe4] sm:$0xf0] }
  0x3b   :  { %1413 = vmatmul.bf16.vlgmr.msra.gmra.mxu0 %v4225_v4  ;;  %1426 = vmatmul.bf16.vlgmr.msra.gmra.mxu1 %v4231_v7  ;;  %v2835_v53 = vor.u32 %v3711_v42, %v2832_v43  ;;  %v3695_v9 = vld [vmem:[%s5596_s1 + $0x204] sm:$0xf]  ;;  %v2902_v23 = vld [vmem:[%s5596_s1 + $0x308] sm:$0xf] }
  0x3c   :  { %1483 = vmatpush.bf16.msrb.mxu1 %v3251_v46  ;;  %1461 = vmatpush.bf16.msrb.mxu3 %v2611_v6  ;;  %v3775_v46 = vld [vmem:[%s5596_s1 + $0x484] sm:$0xf]  ;;  %v3740_v6 = vld [vmem:[%s5596_s1 + $0x364] sm:$0xf0] }
  0x3d   :  { %1439 = vmatmul.bf16.vlgmr.msra.gmra.mxu2 %v4199_v56  ;;  %v3024_v13 = vld [vmem:[%s5596_s1 + $0x420] sm:$0xf0]  ;;  %v3732_v24 = vld [vmem:[%s5596_s1 + $0x324] sm:$0xf0] }
  0x3e   :  { %1500 = vmatpush.bf16.msrb.mxu2 %v1385_v47  ;;  %1471 = vmatpush.bf16.msrb.mxu0 %v2963_v58  ;;  %v3088_v47 = vld [vmem:[%s5596_s1 + $0x4a0] sm:$0xf0]  ;;  %v2582_v28 = vld [vmem:[%s5596_s1 + $0x88] sm:$0xf]  ;;  %v2903_v34 = vor.u32 %v3732_v24, %v2902_v23  ;;  %v3256_v23 = vld [vmem:[%s5596_s1 + $0x5e8] sm:$0xf0] }
  0x3f   :  { %v3091_v55 = vor.u32 %v3775_v46, %v3088_v47  ;;  %v3703_v58 = vld [vmem:[%s5596_s1 + $0x244] sm:$0xf]  ;;  %v3222_v29 = vld [vmem:[%s5596_s1 + $0x588] sm:$0xf] }
  0x40   :  { %1484 = vmatpush.bf16.msrb.mxu1 %v3219_v61  ;;  %1462 = vmatpush.bf16.msrb.mxu3 %v2579_v20  ;;  %v3767_v61 = vld [vmem:[%s5596_s1 + $0x444] sm:$0xf]  ;;  %v2803_v3 = vor.u32 %v3703_v58, %v2800_v59  ;;  %v2935_v20 = vor.u32 %v3740_v6, %v2934_v5  ;;  %v3652_v31 = vld [vmem:[%s5596_s1 + $0xa4] sm:$0xf0] }
  0x41   :  { %v3350_v32 = vld [vmem:[%s5596_s1 + $0x688] sm:$0xf] }
  0x42   :  { %1501 = vmatpush.bf16.msrb.mxu2 %v3347_v62  ;;  %1472 = vmatpush.bf16.msrb.mxu0 %v2931_v10  ;;  %v3056_v62 = vld [vmem:[%s5596_s1 + $0x460] sm:$0xf0]  ;;  %v2870_v35 = vld [vmem:[%s5596_s1 + $0x2c8] sm:$0xf] }
  0x43   :  { %v3059_v8 = vor.u32 %v3767_v61, %v3056_v62  ;;  %v2768_v10 = vld [vmem:[%s5596_s1 + $0x220] sm:$0xf0]  ;;  %v3724_v36 = vld [vmem:[%s5596_s1 + $0x2e4] sm:$0xf0]  ;;  %v3688_v61 = vld [vmem:[%s5596_s1 + $0x1cc] sm:$0xf] }
  0x44   :  { %1485 = vmatpush.bf16.msrb.mxu1 %v3187_v11  ;;  %1463 = vmatpush.bf16.msrb.mxu3 %v2547_v33  ;;  %v3759_v11 = vld [vmem:[%s5596_s1 + $0x404] sm:$0xf]  ;;  %v2771_v21 = vor.u32 %v3695_v9, %v2768_v10  ;;  %v3844_v33 = vld [vmem:[%s5596_s1 + $0x6a4] sm:$0xf0]  ;;  %v2871_v47 = vor.u32 %v3724_v36, %v2870_v35  ;;  %v3808_v35 = vld [vmem:[%s5596_s1 + $0x58c] sm:$0xf] }
  0x45   :  { %v3027_v22 = vor.u32 %v3759_v11, %v3024_v13  ;;  %v3351_v39 = vor.u32 %v3844_v33, %v3350_v32  ;;  %v3804_v42 = vld [vmem:[%s5596_s1 + $0x564] sm:$0xf0]  ;;  %v2747_v11 = vor.u32 %v3688_v61, %v2744_v63  ;;  %v3680_v13 = vld [vmem:[%s5596_s1 + $0x18c] sm:$0xf] }
  0x46   :  { %1502 = vmatpush.bf16.msrb.mxu2 %v3315_v12  ;;  %1473 = vmatpush.bf16.msrb.mxu0 %v2899_v18  ;;  %v2647_v12 = vor.u32 %v3668_v1, %v2646_v0  ;;  %v3255_v18 = vor.u32 %v3820_v15, %v3254_v14  ;;  %v3644_v43 = vld [vmem:[%s5596_s1 + $0x64] sm:$0xf0]  ;;  %v3191_v50 = vor.u32 %v3804_v42, %v3190_v41  ;;  %v3752_v0 = vld [vmem:[%s5596_s1 + $0x3cc] sm:$0xf] }
  0x47   :  { %v3836_v46 = vld [vmem:[%s5596_s1 + $0x664] sm:$0xf0]  ;;  %v3000_v1 = vld [vmem:[%s5596_s1 + $0x3e8] sm:$0xf0] }
  0x48   :  { %1486 = vmatpush.bf16.msrb.mxu1 %v3155_v25  ;;  %1464 = vmatpush.bf16.msrb.mxu3 %v2515_v48  ;;  %v2615_v25 = vor.u32 %v3660_v19, %v2614_v17  ;;  %v2838_v48 = vld [vmem:[%s5596_s1 + $0x288] sm:$0xf]  ;;  %v2712_v15 = vld [vmem:[%s5596_s1 + $0x1a8] sm:$0xf0] }
  0x49   :  { %v3158_v57 = vld [vmem:[%s5596_s1 + $0x508] sm:$0xf]  ;;  %v2839_v62 = vor.u32 %v3716_v49, %v2838_v48  ;;  %v2968_v17 = vld [vmem:[%s5596_s1 + $0x3a8] sm:$0xf0] }
  0x4a   :  { %1503 = vmatpush.bf16.msrb.mxu2 %v3283_v27  ;;  %1474 = vmatpush.bf16.msrb.mxu0 %v2867_v38  ;;  %v1388_v27 = vand.u32 %v4013_v26, %v1151_v16  ;;  %v2583_v38 = vor.u32 %v3652_v31, %v2582_v28  ;;  %v3796_v58 = vld [vmem:[%s5596_s1 + $0x524] sm:$0xf0]  ;;  %v3744_v16 = vld [vmem:[%s5596_s1 + $0x38c] sm:$0xf] }
  0x4b   :  { %1465 = vmatmul.bf16.vlgmr.msrb.gmra.mxu3 %v4225_v4  ;;  %v3286_v59 = vld [vmem:[%s5596_s1 + $0x608] sm:$0xf]  ;;  %v3159_v5 = vor.u32 %v3796_v58, %v3158_v57  ;;  %v3672_v28 = vld [vmem:[%s5596_s1 + $0x14c] sm:$0xf] }
  0x4c   :  { %1487 = vmatpush.bf16.msrb.mxu1 %v3123_v40  ;;  %1522 = vmatpush.bf16.msra.mxu3 %v2999_v52  ;;  %v2550_v40 = vld [vmem:[%s5596_s1 + $0x48] sm:$0xf]  ;;  %v3736_v31 = vld [vmem:[%s5596_s1 + $0x34c] sm:$0xf] }
  0x4d   :  { %3373 = vmatmul.msk.bf16.vlgmr.msrb.gmra.mxu2 %vm1373_vm2, %v4173_v45  ;;  %v2518_v52 = vld [vmem:[%s5596_s1 + $0x8] sm:$0xf]  ;;  %v2936_v32 = vld [vmem:[%s5596_s1 + $0x368] sm:$0xf0] }
  0x4e   :  { %1509 = vmatpush.bf16.msra.mxu2 %v2743_v30  ;;  %1475 = vmatpush.bf16.msrb.mxu0 %v2835_v53  ;;  %v3812_v30 = vld [vmem:[%s5596_s1 + $0x5a4] sm:$0xf0]  ;;  %v2551_v53 = vor.u32 %v3644_v43, %v2550_v40  ;;  %v3224_v36 = vld [vmem:[%s5596_s1 + $0x5a8] sm:$0xf0]  ;;  %v2939_v41 = vor.u32 %v3736_v31, %v2936_v32 }
  0x4f   :  { %v3223_v37 = vor.u32 %v3812_v30, %v3222_v29  ;;  %v3126_v9 = vld [vmem:[%s5596_s1 + $0x4c8] sm:$0xf]  ;;  %v2680_v30 = vld [vmem:[%s5596_s1 + $0x168] sm:$0xf0] }
  0x50   :  { %1488 = vmatpush.bf16.msrb.mxu1 %v3091_v55  ;;  %1523 = vmatpush.bf16.msra.mxu3 %v2967_v2  ;;  %v3636_v55 = vld [vmem:[%s5596_s1 + $0x24] sm:$0xf0]  ;;  %v2683_v40 = vor.u32 %v3672_v28, %v2680_v30  ;;  %v3664_v42 = vld [vmem:[%s5596_s1 + $0x10c] sm:$0xf] }
  0x51   :  { %v2806_v2 = vld [vmem:[%s5596_s1 + $0x248] sm:$0xf]  ;;  %v2519_v6 = vor.u32 %v3636_v55, %v2518_v52  ;;  %v2648_v43 = vld [vmem:[%s5596_s1 + $0x128] sm:$0xf0] }
  0x52   :  { %1510 = vmatpush.bf16.msra.mxu2 %v2711_v44  ;;  %1476 = vmatpush.bf16.msrb.mxu0 %v2803_v3  ;;  %v3318_v44 = vld [vmem:[%s5596_s1 + $0x648] sm:$0xf]  ;;  %v3800_v48 = vld [vmem:[%s5596_s1 + $0x54c] sm:$0xf] }
  0x53   :  { %v3319_v54 = vor.u32 %v3836_v46, %v3318_v44  ;;  %v3708_v3 = vld [vmem:[%s5596_s1 + $0x264] sm:$0xf0]  ;;  %v3728_v44 = vld [vmem:[%s5596_s1 + $0x30c] sm:$0xf]  ;;  %v3227_v46 = vor.u32 %v3808_v35, %v3224_v36  ;;  %v4650_v36 = vld [vmem:[%s5596_s1 + $0x6d0] sm:$0xff] }
  0x54   :  { %1489 = vmatpush.bf16.msrb.mxu1 %v3059_v8  ;;  %1524 = vmatpush.bf16.msra.mxu3 %v2935_v20  ;;  %v3788_v10 = vld [vmem:[%s5596_s1 + $0x4e4] sm:$0xf0]  ;;  %v2807_v14 = vor.u32 %v3708_v3, %v2806_v2  ;;  %v3192_v49 = vld [vmem:[%s5596_s1 + $0x568] sm:$0xf0] }
  0x55   :  { %v2774_v19 = vld [vmem:[%s5596_s1 + $0x208] sm:$0xf]  ;;  %v3656_v57 = vld [vmem:[%s5596_s1 + $0xcc] sm:$0xf]  ;;  %v3195_v61 = vor.u32 %v3800_v48, %v3192_v49  ;;  %v929_v48 = vunpack.c.l.b16 %v4650_v36 }
  0x56   :  { %1511 = vmatpush.bf16.msra.mxu2 %v2679_v60  ;;  %1477 = vmatpush.bf16.msrb.mxu0 %v2771_v21  ;;  %v3828_v60 = vld [vmem:[%s5596_s1 + $0x624] sm:$0xf0]  ;;  %v3127_v21 = vor.u32 %v3788_v10, %v3126_v9  ;;  %v2616_v58 = vld [vmem:[%s5596_s1 + $0xe8] sm:$0xf0] }
  0x57   :  { %v3287_v8 = vor.u32 %v3828_v60, %v3286_v59  ;;  %v3700_v20 = vld [vmem:[%s5596_s1 + $0x224] sm:$0xf0]  ;;  %v3720_v59 = vld [vmem:[%s5596_s1 + $0x2cc] sm:$0xf]  ;;  %v2619_v2 = vor.u32 %v3656_v57, %v2616_v58 }
  0x58   :  { %1490 = vmatpush.bf16.msrb.mxu1 %v3027_v22  ;;  %1525 = vmatpush.bf16.msra.mxu3 %v2903_v34  ;;  %v3816_v22 = vld [vmem:[%s5596_s1 + $0x5cc] sm:$0xf]  ;;  %v3094_v24 = vld [vmem:[%s5596_s1 + $0x488] sm:$0xf]  ;;  %v2775_v29 = vor.u32 %v3700_v20, %v2774_v19 }
  0x59   :  { %1478 = vmatmul.bf16.vlgmr.msrb.gmra.mxu0 %v4231_v7  ;;  %v3259_v33 = vor.u32 %v3816_v22, %v3256_v23  ;;  %v3764_v52 = vld [vmem:[%s5596_s1 + $0x424] sm:$0xf0]  ;;  %v2872_v60 = vld [vmem:[%s5596_s1 + $0x2e8] sm:$0xf0] }
  0x5a   :  { %1512 = vmatpush.bf16.msra.mxu2 %v2647_v12  ;;  %1535 = vmatpush.bf16.msra.mxu0 %v3255_v18  ;;  %v3003_v12 = vor.u32 %v3752_v0, %v3000_v1  ;;  %v3780_v18 = vld [vmem:[%s5596_s1 + $0x4a4] sm:$0xf0]  ;;  %v3792_v63 = vld [vmem:[%s5596_s1 + $0x50c] sm:$0xf]  ;;  %v2875_v3 = vor.u32 %v3720_v59, %v2872_v60  ;;  %v3685_v59 = vld [vmem:[%s5596_s1 + $0x1ac] sm:$0xf0] }
  0x5b   :  { %1491 = vmatmul.bf16.vlgmr.msrb.gmra.mxu1 %v4199_v56  ;;  %v3095_v34 = vor.u32 %v3780_v18, %v3094_v24  ;;  %v3160_v0 = vld [vmem:[%s5596_s1 + $0x528] sm:$0xf0]  ;;  %v2974_v60 = vld [vmem:[%s5596_s1 + $0x390] sm:$0xf] }
  0x5c   :  { %1552 = vmatpush.bf16.msra.mxu1 %v1388_v27  ;;  %1526 = vmatpush.bf16.msra.mxu3 %v2871_v47  ;;  %v2971_v27 = vor.u32 %v3744_v16, %v2968_v17  ;;  %v2584_v9 = vld [vmem:[%s5596_s1 + $0xa8] sm:$0xf0] }
  0x5d   :  { %v3712_v10 = vld [vmem:[%s5596_s1 + $0x28c] sm:$0xf] }
  0x5e   :  { %1513 = vmatpush.bf16.msra.mxu2 %v2615_v25  ;;  %1536 = vmatpush.bf16.msra.mxu0 %v3223_v37  ;;  %v2715_v25 = vor.u32 %v3680_v13, %v2712_v15  ;;  %v3062_v37 = vld [vmem:[%s5596_s1 + $0x448] sm:$0xf]  ;;  %v3784_v13 = vld [vmem:[%s5596_s1 + $0x4cc] sm:$0xf] }
  0x5f   :  { %v3640_v19 = vld [vmem:[%s5596_s1 + $0x4c] sm:$0xf] }
  0x60   :  { %1553 = vmatpush.bf16.msra.mxu1 %v3351_v39  ;;  %1527 = vmatpush.bf16.msra.mxu3 %v2839_v62  ;;  %v928_v39 = vunpack.c.h.b16 %v4322_v51  ;;  %v2904_v51 = vld [vmem:[%s5596_s1 + $0x328] sm:$0xf0] }
  0x61   :  { %v2907_v55 = vor.u32 %v3728_v44, %v2904_v51  ;;  %v3832_v20 = vld [vmem:[%s5596_s1 + $0x64c] sm:$0xf] }
  0x62   :  { %1514 = vmatpush.bf16.msra.mxu2 %v2583_v38  ;;  %1537 = vmatpush.bf16.msra.mxu0 %v3191_v50  ;;  %v3772_v38 = vld [vmem:[%s5596_s1 + $0x464] sm:$0xf0]  ;;  %v2552_v22 = vld [vmem:[%s5596_s1 + $0x68] sm:$0xf0] }
  0x63   :  { %v3063_v47 = vor.u32 %v3772_v38, %v3062_v37  ;;  %v3030_v50 = vld [vmem:[%s5596_s1 + $0x408] sm:$0xf]  ;;  %v3704_v23 = vld [vmem:[%s5596_s1 + $0x24c] sm:$0xf]  ;;  %v2555_v32 = vor.u32 %v3640_v19, %v2552_v22  ;;  %v3669_v22 = vld [vmem:[%s5596_s1 + $0x12c] sm:$0xf0] }
  0x64   :  { %1554 = vmatpush.bf16.msra.mxu1 %v3319_v54  ;;  %1528 = vmatpush.bf16.msra.mxu3 %v2807_v14  ;;  %v2651_v54 = vor.u32 %v3664_v42, %v2648_v43  ;;  %v3031_v62 = vor.u32 %v3764_v52, %v3030_v50  ;;  %v3128_v14 = vld [vmem:[%s5596_s1 + $0x4e8] sm:$0xf0]  ;;  %v3006_v42 = vld [vmem:[%s5596_s1 + $0x3d0] sm:$0xf] }
  0x65   :  { %v2808_v24 = vld [vmem:[%s5596_s1 + $0x268] sm:$0xf0]  ;;  %v3131_v18 = vor.u32 %v3784_v13, %v3128_v14  ;;  %v3757_v43 = vld [vmem:[%s5596_s1 + $0x3ec] sm:$0xf0] }
  0x66   :  { %1515 = vmatpush.bf16.msra.mxu2 %v2551_v53  ;;  %1538 = vmatpush.bf16.msra.mxu0 %v3159_v5  ;;  %v1152_v53 = vpack.c.b16 %v928_v39, %v928_v39  ;;  %v3648_v5 = vld [vmem:[%s5596_s1 + $0x8c] sm:$0xf]  ;;  %v2750_v39 = vld [vmem:[%s5596_s1 + $0x1d0] sm:$0xf] }
  0x67   :  { %v2587_v16 = vor.u32 %v3648_v5, %v2584_v9  ;;  %v2520_v30 = vld [vmem:[%s5596_s1 + $0x28] sm:$0xf0]  ;;  %v3677_v9 = vld [vmem:[%s5596_s1 + $0x16c] sm:$0xf0] }
  0x68   :  { %1555 = vmatpush.bf16.msra.mxu1 %v3287_v8  ;;  %1529 = vmatpush.bf16.msra.mxu3 %v2775_v29  ;;  %v1391_v1 = vand.u32 %v4013_v26, %v1152_v53  ;;  %v3352_v8 = vld [vmem:[%s5596_s1 + $0x6a8] sm:$0xf0]  ;;  %v3007_v53 = vor.u32 %v3757_v43, %v3006_v42  ;;  %v3198_v13 = vld [vmem:[%s5596_s1 + $0x550] sm:$0xf] }
  0x69   :  { %v3632_v29 = vld [vmem:[%s5596_s1 + $0xc] sm:$0xf]  ;;  %v3805_v14 = vld [vmem:[%s5596_s1 + $0x56c] sm:$0xf0] }
  0x6a   :  { %1516 = vmatpush.bf16.msra.mxu2 %v2519_v6  ;;  %1539 = vmatpush.bf16.msra.mxu0 %v3127_v21  ;;  %v3840_v6 = vld [vmem:[%s5596_s1 + $0x68c] sm:$0xf]  ;;  %v2523_v49 = vor.u32 %v3632_v29, %v2520_v30  ;;  %v3837_v29 = vld [vmem:[%s5596_s1 + $0x66c] sm:$0xf0] }
  0x6b   :  { %3374 = vmatmul.msk.bf16.vlgmr.msra.gmra.mxu1 %vm1373_vm2, %v4173_v45  ;;  %1530 = vmatmul.bf16.vlgmr.msra.gmra.mxu3 %v4231_v7  ;;  %v3355_v15 = vor.u32 %v3840_v6, %v3352_v8  ;;  %v3320_v21 = vld [vmem:[%s5596_s1 + $0x668] sm:$0xf0]  ;;  %v2686_v8 = vld [vmem:[%s5596_s1 + $0x150] sm:$0xf] }
  0x6c   :  { %1561 = vmatpush.bf16.msrb.mxu1 %v2747_v11  ;;  %1587 = vmatpush.bf16.msrb.mxu3 %v3259_v33  ;;  %v2840_v11 = vld [vmem:[%s5596_s1 + $0x2a8] sm:$0xf0]  ;;  %v3323_v28 = vor.u32 %v3832_v20, %v3320_v21  ;;  %v2811_v33 = vor.u32 %v3704_v23, %v2808_v24  ;;  %v3199_v20 = vor.u32 %v3805_v14, %v3198_v13  ;;  %v2654_v21 = vld [vmem:[%s5596_s1 + $0x110] sm:$0xf] }
  0x6d   :  { %1517 = vmatmul.bf16.vlgmr.msra.gmra.mxu2 %v4225_v4  ;;  %v2843_v17 = vor.u32 %v3712_v10, %v2840_v11  ;;  %v3696_v31 = vld [vmem:[%s5596_s1 + $0x20c] sm:$0xf]  ;;  %v2942_v10 = vld [vmem:[%s5596_s1 + $0x350] sm:$0xf]  ;;  %v2655_v30 = vor.u32 %v3669_v22, %v2654_v21  ;;  %v3008_v22 = vld [vmem:[%s5596_s1 + $0x3f0] sm:$0xf0] }
  0x6e   :  { %1574 = vmatpush.bf16.msrb.mxu2 %v3003_v12  ;;  %1540 = vmatpush.bf16.msra.mxu0 %v3095_v34  ;;  %v3163_v12 = vor.u32 %v3792_v63, %v3160_v0  ;;  %v3824_v34 = vld [vmem:[%s5596_s1 + $0x60c] sm:$0xf]  ;;  %v3230_v63 = vld [vmem:[%s5596_s1 + $0x590] sm:$0xf] }
  0x6f   :  { %v3288_v35 = vld [vmem:[%s5596_s1 + $0x628] sm:$0xf0]  ;;  %v3813_v0 = vld [vmem:[%s5596_s1 + $0x5ac] sm:$0xf0] }
  0x70   :  { %1562 = vmatpush.bf16.msrb.mxu1 %v2715_v25  ;;  %1588 = vmatpush.bf16.msrb.mxu3 %v3227_v46  ;;  %v3776_v25 = vld [vmem:[%s5596_s1 + $0x48c] sm:$0xf]  ;;  %v3291_v51 = vor.u32 %v3824_v34, %v3288_v35  ;;  %v3262_v46 = vld [vmem:[%s5596_s1 + $0x5d0] sm:$0xf]  ;;  %v3231_v6 = vor.u32 %v3813_v0, %v3230_v63 }
  0x71   :  { %v2776_v37 = vld [vmem:[%s5596_s1 + $0x228] sm:$0xf0]  ;;  %v2910_v23 = vld [vmem:[%s5596_s1 + $0x310] sm:$0xf] }
  0x72   :  { %1575 = vmatpush.bf16.msrb.mxu2 %v2971_v27  ;;  %1541 = vmatpush.bf16.msra.mxu0 %v3063_v47  ;;  %v3096_v27 = vld [vmem:[%s5596_s1 + $0x4a8] sm:$0xf0]  ;;  %v3821_v47 = vld [vmem:[%s5596_s1 + $0x5ec] sm:$0xf0]  ;;  %v2779_v50 = vor.u32 %v3696_v31, %v2776_v37 }
  0x73   :  { %v3768_v38 = vld [vmem:[%s5596_s1 + $0x44c] sm:$0xf]  ;;  %v3263_v58 = vor.u32 %v3821_v47, %v3262_v46  ;;  %v3661_v34 = vld [vmem:[%s5596_s1 + $0xec] sm:$0xf0] }
  0x74   :  { %1563 = vmatpush.bf16.msrb.mxu1 %v2683_v40  ;;  %1589 = vmatpush.bf16.msrb.mxu3 %v3195_v61  ;;  %v3099_v40 = vor.u32 %v3776_v25, %v3096_v27  ;;  %v3064_v44 = vld [vmem:[%s5596_s1 + $0x468] sm:$0xf0]  ;;  %v3749_v61 = vld [vmem:[%s5596_s1 + $0x3ac] sm:$0xf0] }
  0x75   :  { %v3067_v57 = vor.u32 %v3768_v38, %v3064_v44  ;;  %v3166_v25 = vld [vmem:[%s5596_s1 + $0x510] sm:$0xf]  ;;  %v3689_v44 = vld [vmem:[%s5596_s1 + $0x1d4] sm:$0xf] }
  0x76   :  { %1576 = vmatpush.bf16.msrb.mxu2 %v2939_v41  ;;  %1542 = vmatpush.bf16.msra.mxu0 %v3031_v62  ;;  %v3693_v41 = vld [vmem:[%s5596_s1 + $0x1ec] sm:$0xf0]  ;;  %v3032_v62 = vld [vmem:[%s5596_s1 + $0x428] sm:$0xf0] }
  0x77   :  { %v2751_v52 = vor.u32 %v3693_v41, %v2750_v39  ;;  %v3797_v27 = vld [vmem:[%s5596_s1 + $0x52c] sm:$0xf0] }
  0x78   :  { %1564 = vmatpush.bf16.msrb.mxu1 %v2651_v54  ;;  %1590 = vmatpush.bf16.msrb.mxu3 %v3163_v12  ;;  %v3760_v54 = vld [vmem:[%s5596_s1 + $0x40c] sm:$0xf]  ;;  %v3741_v12 = vld [vmem:[%s5596_s1 + $0x36c] sm:$0xf0] }
  0x79   :  { %1543 = vmatmul.bf16.vlgmr.msra.gmra.mxu0 %v4199_v56  ;;  %v3035_v5 = vor.u32 %v3760_v54, %v3032_v62  ;;  %v2943_v19 = vor.u32 %v3741_v12, %v2942_v10  ;;  %v2878_v35 = vld [vmem:[%s5596_s1 + $0x2d0] sm:$0xf]  ;;  %v3673_v10 = vld [vmem:[%s5596_s1 + $0x154] sm:$0xf] }
  0x7a   :  { %1577 = vmatpush.bf16.msrb.mxu2 %v2907_v55  ;;  %1604 = vmatpush.bf16.msrb.mxu0 %v1391_v1  ;;  %v2718_v55 = vld [vmem:[%s5596_s1 + $0x190] sm:$0xf]  ;;  %v1153_v1 = vpack.c.b16 %v929_v48, %v929_v48 }
  0x7b   :  { %v3725_v38 = vld [vmem:[%s5596_s1 + $0x2ec] sm:$0xf0] }
  0x7c   :  { %1565 = vmatpush.bf16.msrb.mxu1 %v2619_v2  ;;  %1591 = vmatpush.bf16.msrb.mxu3 %v3131_v18  ;;  %v2719_v2 = vor.u32 %v3685_v59, %v2718_v55  ;;  %v1394_v11 = vand.u32 %v4013_v26, %v1153_v1  ;;  %v3733_v18 = vld [vmem:[%s5596_s1 + $0x32c] sm:$0xf0]  ;;  %v2879_v46 = vor.u32 %v3725_v38, %v2878_v35  ;;  %v3681_v59 = vld [vmem:[%s5596_s1 + $0x194] sm:$0xf] }
  0x7d   :  { %v2911_v31 = vor.u32 %v3733_v18, %v2910_v23  ;;  %v3134_v39 = vld [vmem:[%s5596_s1 + $0x4d0] sm:$0xf]  ;;  %v3817_v23 = vld [vmem:[%s5596_s1 + $0x5d4] sm:$0xf] }
  0x7e   :  { %1578 = vmatpush.bf16.msrb.mxu2 %v2875_v3  ;;  %1605 = vmatpush.bf16.msrb.mxu0 %v3355_v15  ;;  %v2975_v3 = vor.u32 %v3749_v61, %v2974_v60  ;;  %v3358_v15 = vld [vmem:[%s5596_s1 + $0x690] sm:$0xf]  ;;  %v2720_v60 = vld [vmem:[%s5596_s1 + $0x1b0] sm:$0xf0] }
  0x7f   :  { %v3294_v41 = vld [vmem:[%s5596_s1 + $0x610] sm:$0xf]  ;;  %v2976_v38 = vld [vmem:[%s5596_s1 + $0x3b0] sm:$0xf0] }
  0x80   :  { %1566 = vmatpush.bf16.msrb.mxu1 %v2587_v16  ;;  %1592 = vmatpush.bf16.msrb.mxu3 %v3099_v40  ;;  %v3845_v16 = vld [vmem:[%s5596_s1 + $0x6ac] sm:$0xf0] }
  0x81   :  { %v3359_v24 = vor.u32 %v3845_v16, %v3358_v15  ;;  %v3789_v40 = vld [vmem:[%s5596_s1 + $0x4ec] sm:$0xf0] }
  0x82   :  { %1579 = vmatpush.bf16.msrb.mxu2 %v2843_v17  ;;  %1606 = vmatpush.bf16.msrb.mxu0 %v3323_v28  ;;  %v2687_v17 = vor.u32 %v3677_v9, %v2686_v8  ;;  %v3326_v28 = vld [vmem:[%s5596_s1 + $0x650] sm:$0xf]  ;;  %v3135_v47 = vor.u32 %v3789_v40, %v3134_v39  ;;  %v930_v8 = vunpack.c.h.b16 %v4650_v36  ;;  %v3809_v39 = vld [vmem:[%s5596_s1 + $0x594] sm:$0xf] }
  0x83   :  { %v3327_v37 = vor.u32 %v3837_v29, %v3326_v28  ;;  %v3829_v42 = vld [vmem:[%s5596_s1 + $0x62c] sm:$0xf0]  ;;  %v2656_v28 = vld [vmem:[%s5596_s1 + $0x130] sm:$0xf0] }
  0x84   :  { %1567 = vmatpush.bf16.msrb.mxu1 %v2555_v32  ;;  %1593 = vmatpush.bf16.msrb.mxu3 %v3067_v57  ;;  %v3167_v32 = vor.u32 %v3797_v27, %v3166_v25  ;;  %v2590_v48 = vld [vmem:[%s5596_s1 + $0x90] sm:$0xf]  ;;  %v1154_v18 = vpack.c.b16 %v930_v8, %v930_v8  ;;  %v3665_v27 = vld [vmem:[%s5596_s1 + $0x114] sm:$0xf]  ;;  %v2758_v8 = vld [vmem:[%s5596_s1 + $0x1d8] sm:$0xf] }
  0x85   :  { %v3102_v54 = vld [vmem:[%s5596_s1 + $0x490] sm:$0xf]  ;;  %v2659_v35 = vor.u32 %v3665_v27, %v2656_v28  ;;  %v3232_v40 = vld [vmem:[%s5596_s1 + $0x5b0] sm:$0xf0] }
  0x86   :  { %1580 = vmatpush.bf16.msrb.mxu2 %v2811_v33  ;;  %1607 = vmatpush.bf16.msrb.mxu0 %v3291_v51  ;;  %v2622_v33 = vld [vmem:[%s5596_s1 + $0xd0] sm:$0xf]  ;;  %v2752_v51 = vld [vmem:[%s5596_s1 + $0x1f0] sm:$0xf0] }
  0x87   :  { %v2623_v43 = vor.u32 %v3661_v34, %v2622_v33  ;;  %v3781_v55 = vld [vmem:[%s5596_s1 + $0x4ac] sm:$0xf0]  ;;  %v2755_v57 = vor.u32 %v3689_v44, %v2752_v51  ;;  %v3657_v33 = vld [vmem:[%s5596_s1 + $0xd4] sm:$0xf]  ;;  %v3235_v51 = vor.u32 %v3809_v39, %v3232_v40  ;;  %v3750_v39 = vld [vmem:[%s5596_s1 + $0x3b4] sm:$0xf0] }
  0x88   :  { %1568 = vmatpush.bf16.msrb.mxu1 %v2523_v49  ;;  %1594 = vmatpush.bf16.msrb.mxu3 %v3035_v5  ;;  %v3653_v49 = vld [vmem:[%s5596_s1 + $0xac] sm:$0xf0]  ;;  %v3103_v62 = vor.u32 %v3781_v55, %v3102_v54  ;;  %v3745_v34 = vld [vmem:[%s5596_s1 + $0x394] sm:$0xf] }
  0x89   :  { %3375 = vmatmul.msk.bf16.vlgmr.msrb.gmra.mxu0 %vm1373_vm2, %v4173_v45  ;;  %v2558_v63 = vld [vmem:[%s5596_s1 + $0x50] sm:$0xf]  ;;  %v2979_v44 = vor.u32 %v3745_v34, %v2976_v38  ;;  %v2592_v54 = vld [vmem:[%s5596_s1 + $0xb0] sm:$0xf0]  ;;  %v2694_v34 = vld [vmem:[%s5596_s1 + $0x158] sm:$0xf] }
  0x8a   :  { %1581 = vmatpush.bf16.msrb.mxu2 %v2779_v50  ;;  %1613 = vmatpush.bf16.msra.mxu0 %v2751_v52  ;;  %v2846_v50 = vld [vmem:[%s5596_s1 + $0x290] sm:$0xf]  ;;  %v3295_v52 = vor.u32 %v3829_v42, %v3294_v41  ;;  %v2624_v41 = vld [vmem:[%s5596_s1 + $0xf0] sm:$0xf0]  ;;  %v2982_v38 = vld [vmem:[%s5596_s1 + $0x398] sm:$0xf] }
  0x8b   :  { %1569 = vmatmul.bf16.vlgmr.msrb.gmra.mxu1 %v4225_v4  ;;  %1595 = vmatmul.bf16.vlgmr.msrb.gmra.mxu3 %v4199_v56  ;;  %v3645_v0 = vld [vmem:[%s5596_s1 + $0x6c] sm:$0xf0]  ;;  %v3841_v42 = vld [vmem:[%s5596_s1 + $0x694] sm:$0xf] }
  0x8c   :  { %1626 = vmatpush.bf16.msra.mxu1 %v3007_v53  ;;  %1656 = vmatpush.bf16.msra.mxu3 %v1394_v11  ;;  %v3717_v53 = vld [vmem:[%s5596_s1 + $0x2ac] sm:$0xf0]  ;;  %v2559_v9 = vor.u32 %v3645_v0, %v2558_v63  ;;  %v2688_v11 = vld [vmem:[%s5596_s1 + $0x170] sm:$0xf0] }
  0x8d   :  { %1582 = vmatmul.bf16.vlgmr.msrb.gmra.mxu2 %v4231_v7  ;;  %v2847_v61 = vor.u32 %v3717_v53, %v2846_v50  ;;  %v2814_v1 = vld [vmem:[%s5596_s1 + $0x250] sm:$0xf]  ;;  %v2691_v21 = vor.u32 %v3673_v10, %v2688_v11  ;;  %v2944_v50 = vld [vmem:[%s5596_s1 + $0x370] sm:$0xf0] }
  0x8e   :  { %1639 = vmatpush.bf16.msra.mxu2 %v3263_v58  ;;  %1614 = vmatpush.bf16.msra.mxu0 %v2719_v2  ;;  %v2591_v58 = vor.u32 %v3653_v49, %v2590_v48  ;;  %v3709_v2 = vld [vmem:[%s5596_s1 + $0x26c] sm:$0xf0]  ;;  %v2627_v48 = vor.u32 %v3657_v33, %v2624_v41  ;;  %v3200_v53 = vld [vmem:[%s5596_s1 + $0x570] sm:$0xf0] }
  0x8f   :  { %v3773_v5 = vld [vmem:[%s5596_s1 + $0x46c] sm:$0xf0]  ;;  %v2815_v13 = vor.u32 %v3709_v2, %v2814_v1  ;;  %v3833_v55 = vld [vmem:[%s5596_s1 + $0x654] sm:$0xf] }
  0x90   :  { %1627 = vmatpush.bf16.msra.mxu1 %v2975_v3  ;;  %1657 = vmatpush.bf16.msra.mxu3 %v3359_v24  ;;  %v3070_v3 = vld [vmem:[%s5596_s1 + $0x450] sm:$0xf]  ;;  %v3264_v24 = vld [vmem:[%s5596_s1 + $0x5f0] sm:$0xf0] }
  0x91   :  { %v2526_v12 = vld [vmem:[%s5596_s1 + $0x10] sm:$0xf]  ;;  %v3071_v14 = vor.u32 %v3773_v5, %v3070_v3  ;;  %v2912_v0 = vld [vmem:[%s5596_s1 + $0x330] sm:$0xf0] }
  0x92   :  { %1640 = vmatpush.bf16.msra.mxu2 %v3231_v6  ;;  %1615 = vmatpush.bf16.msra.mxu0 %v2687_v17  ;;  %v2723_v6 = vor.u32 %v3681_v59, %v2720_v60  ;;  %v3637_v36 = vld [vmem:[%s5596_s1 + $0x2c] sm:$0xf0]  ;;  %v3641_v60 = vld [vmem:[%s5596_s1 + $0x54] sm:$0xf] }
  0x93   :  { %v2782_v15 = vld [vmem:[%s5596_s1 + $0x210] sm:$0xf]  ;;  %v2527_v25 = vor.u32 %v3637_v36, %v2526_v12  ;;  %v3793_v1 = vld [vmem:[%s5596_s1 + $0x514] sm:$0xf] }
  0x94   :  { %1628 = vmatpush.bf16.msra.mxu1 %v2943_v19  ;;  %1658 = vmatpush.bf16.msra.mxu3 %v3327_v37  ;;  %v3701_v16 = vld [vmem:[%s5596_s1 + $0x22c] sm:$0xf0]  ;;  %v1397_v37 = vand.u32 %v4013_v26, %v1154_v18  ;;  %v3168_v2 = vld [vmem:[%s5596_s1 + $0x530] sm:$0xf0] }
  0x95   :  { %v3038_v17 = vld [vmem:[%s5596_s1 + $0x410] sm:$0xf]  ;;  %v2783_v29 = vor.u32 %v3701_v16, %v2782_v15  ;;  %v2560_v3 = vld [vmem:[%s5596_s1 + $0x70] sm:$0xf0]  ;;  %v3171_v11 = vor.u32 %v3793_v1, %v3168_v2  ;;  %v3270_v1 = vld [vmem:[%s5596_s1 + $0x5d8] sm:$0xf] }
  0x96   :  { %1641 = vmatpush.bf16.msra.mxu2 %v3199_v20  ;;  %1616 = vmatpush.bf16.msra.mxu0 %v2655_v30  ;;  %v3765_v19 = vld [vmem:[%s5596_s1 + $0x42c] sm:$0xf0]  ;;  %v3753_v20 = vld [vmem:[%s5596_s1 + $0x3d4] sm:$0xf]  ;;  %v3822_v2 = vld [vmem:[%s5596_s1 + $0x5f4] sm:$0xf0] }
  0x97   :  { %v3039_v30 = vor.u32 %v3765_v19, %v3038_v17  ;;  %v3825_v5 = vld [vmem:[%s5596_s1 + $0x614] sm:$0xf] }
  0x98   :  { %1629 = vmatpush.bf16.msra.mxu1 %v2911_v31  ;;  %1659 = vmatpush.bf16.msra.mxu3 %v3295_v52  ;;  %v3011_v31 = vor.u32 %v3753_v20, %v3008_v22  ;;  %v3801_v52 = vld [vmem:[%s5596_s1 + $0x554] sm:$0xf]  ;;  %v3686_v22 = vld [vmem:[%s5596_s1 + $0x1b4] sm:$0xf0] }
  0x99   :  { %v3203_v59 = vor.u32 %v3801_v52, %v3200_v53  ;;  %v3721_v12 = vld [vmem:[%s5596_s1 + $0x2d4] sm:$0xf]  ;;  %v2950_v52 = vld [vmem:[%s5596_s1 + $0x358] sm:$0xf] }
  0x9a   :  { %1642 = vmatpush.bf16.msra.mxu2 %v3167_v32  ;;  %1617 = vmatpush.bf16.msra.mxu0 %v2623_v43  ;;  %v3267_v32 = vor.u32 %v3817_v23, %v3264_v24  ;;  %v3360_v43 = vld [vmem:[%s5596_s1 + $0x6b0] sm:$0xf0]  ;;  %v3014_v23 = vld [vmem:[%s5596_s1 + $0x3d8] sm:$0xf] }
  0x9b   :  { %3376 = vmatmul.msk.bf16.vlgmr.msra.gmra.mxu3 %vm1373_vm2, %v4173_v45  ;;  %v3363_v49 = vor.u32 %v3841_v42, %v3360_v43  ;;  %v2880_v36 = vld [vmem:[%s5596_s1 + $0x2f0] sm:$0xf0]  ;;  %v3758_v24 = vld [vmem:[%s5596_s1 + $0x3f4] sm:$0xf0] }
  0x9c   :  { %1630 = vmatpush.bf16.msra.mxu1 %v2879_v46  ;;  %1665 = vmatpush.bf16.msrb.mxu3 %v2755_v57  ;;  %v3649_v46 = vld [vmem:[%s5596_s1 + $0x94] sm:$0xf]  ;;  %v2883_v18 = vor.u32 %v3721_v12, %v2880_v36  ;;  %v3015_v33 = vor.u32 %v3758_v24, %v3014_v23  ;;  %v3742_v53 = vld [vmem:[%s5596_s1 + $0x374] sm:$0xf0] }
  0x9d   :  { %v3328_v57 = vld [vmem:[%s5596_s1 + $0x670] sm:$0xf0]  ;;  %v2598_v12 = vld [vmem:[%s5596_s1 + $0x98] sm:$0xf] }
  0x9e   :  { %1643 = vmatpush.bf16.msra.mxu2 %v3135_v47  ;;  %1618 = vmatpush.bf16.msra.mxu0 %v2591_v58  ;;  %v3737_v47 = vld [vmem:[%s5596_s1 + $0x354] sm:$0xf]  ;;  %v3331_v63 = vor.u32 %v3833_v55, %v3328_v57 }
  0x9f   :  { %v2947_v58 = vor.u32 %v3737_v47, %v2944_v50  ;;  %v3785_v15 = vld [vmem:[%s5596_s1 + $0x4d4] sm:$0xf]  ;;  %v3670_v50 = vld [vmem:[%s5596_s1 + $0x134] sm:$0xf0] }
  0xa0   :  { %1631 = vmatpush.bf16.msra.mxu1 %v2847_v61  ;;  %1666 = vmatpush.bf16.msrb.mxu3 %v2723_v6  ;;  %v3729_v61 = vld [vmem:[%s5596_s1 + $0x314] sm:$0xf] }
  0xa1   :  { %v3296_v6 = vld [vmem:[%s5596_s1 + $0x630] sm:$0xf0]  ;;  %v2915_v10 = vor.u32 %v3729_v61, %v2912_v0  ;;  %v2630_v0 = vld [vmem:[%s5596_s1 + $0xd8] sm:$0xf] }
  0xa2   :  { %1644 = vmatpush.bf16.msra.mxu2 %v3103_v62  ;;  %1619 = vmatpush.bf16.msra.mxu0 %v2559_v9  ;;  %v2595_v62 = vor.u32 %v3649_v46, %v2592_v54  ;;  %v3694_v9 = vld [vmem:[%s5596_s1 + $0x1f4] sm:$0xf0]  ;;  %v3136_v16 = vld [vmem:[%s5596_s1 + $0x4f0] sm:$0xf0] }
  0xa3   :  { %v2759_v17 = vor.u32 %v3694_v9, %v2758_v8  ;;  %v3633_v19 = vld [vmem:[%s5596_s1 + $0x14] sm:$0xf] }
  0xa4   :  { %1632 = vmatpush.bf16.msra.mxu1 %v2815_v13  ;;  %1667 = vmatpush.bf16.msrb.mxu3 %v2691_v21  ;;  %v2563_v13 = vor.u32 %v3641_v60, %v2560_v3  ;;  %v2528_v20 = vld [vmem:[%s5596_s1 + $0x30] sm:$0xf0]  ;;  %v2726_v21 = vld [vmem:[%s5596_s1 + $0x198] sm:$0xf] }
  0xa5   :  { %v3713_v27 = vld [vmem:[%s5596_s1 + $0x294] sm:$0xf]  ;;  %v2531_v28 = vor.u32 %v3633_v19, %v2528_v20  ;;  %v3662_v3 = vld [vmem:[%s5596_s1 + $0xf4] sm:$0xf0] }
  0xa6   :  { %1645 = vmatpush.bf16.msra.mxu2 %v3071_v14  ;;  %1620 = vmatpush.bf16.msra.mxu0 %v2527_v25  ;;  %v3299_v14 = vor.u32 %v3825_v5, %v3296_v6  ;;  %v3139_v25 = vor.u32 %v3785_v15, %v3136_v16  ;;  %v3705_v42 = vld [vmem:[%s5596_s1 + $0x254] sm:$0xf]  ;;  %v2918_v5 = vld [vmem:[%s5596_s1 + $0x318] sm:$0xf] }
  0xa7   :  { %v2816_v43 = vld [vmem:[%s5596_s1 + $0x270] sm:$0xf0]  ;;  %v3734_v6 = vld [vmem:[%s5596_s1 + $0x334] sm:$0xf0] }
  0xa8   :  { %1633 = vmatpush.bf16.msra.mxu1 %v2783_v29  ;;  %1668 = vmatpush.bf16.msrb.mxu3 %v2659_v35  ;;  %v2848_v29 = vld [vmem:[%s5596_s1 + $0x2b0] sm:$0xf0]  ;;  %v5005_v35 = vld [vmem:[%s5596_s1 + $0x6d8] sm:$0xff]  ;;  %v2819_v54 = vor.u32 %v3705_v42, %v2816_v43  ;;  %v2919_v36 = vor.u32 %v3734_v6, %v2918_v5 }
  0xa9   :  { %1621 = vmatmul.bf16.vlgmr.msra.gmra.mxu0 %v4225_v4  ;;  %v2851_v40 = vor.u32 %v3713_v27, %v2848_v29  ;;  %v931_v46 = vunpack.c.l.b16 %v5005_v35  ;;  %v3697_v57 = vld [vmem:[%s5596_s1 + $0x214] sm:$0xf]  ;;  %v3814_v15 = vld [vmem:[%s5596_s1 + $0x5b4] sm:$0xf0] }
  0xaa   :  { %1646 = vmatpush.bf16.msra.mxu2 %v3039_v30  ;;  %1678 = vmatpush.bf16.msrb.mxu0 %v3011_v31  ;;  %v3777_v30 = vld [vmem:[%s5596_s1 + $0x494] sm:$0xf]  ;;  %v3366_v16 = vld [vmem:[%s5596_s1 + $0x698] sm:$0xf] }
  0xab   :  { %1634 = vmatmul.bf16.vlgmr.msra.gmra.mxu1 %v4231_v7  ;;  %v3104_v31 = vld [vmem:[%s5596_s1 + $0x4b0] sm:$0xf0]  ;;  %v1155_v61 = vpack.c.b16 %v931_v46, %v931_v46  ;;  %v3654_v19 = vld [vmem:[%s5596_s1 + $0xb4] sm:$0xf0] }
  0xac   :  { %1691 = vmatpush.bf16.msrb.mxu1 %v3267_v32  ;;  %1669 = vmatpush.bf16.msrb.mxu3 %v2627_v48  ;;  %v2727_v32 = vor.u32 %v3686_v22, %v2726_v21  ;;  %v3107_v41 = vor.u32 %v3777_v30, %v3104_v31  ;;  %v2983_v48 = vor.u32 %v3750_v39, %v2982_v38  ;;  %v3040_v60 = vld [vmem:[%s5596_s1 + $0x430] sm:$0xf0]  ;;  %v2886_v20 = vld [vmem:[%s5596_s1 + $0x2d8] sm:$0xf] }
  0xad   :  { %1647 = vmatmul.bf16.vlgmr.msra.gmra.mxu2 %v4199_v56  ;;  %v3726_v21 = vld [vmem:[%s5596_s1 + $0x2f4] sm:$0xf0]  ;;  %v2599_v29 = vor.u32 %v3654_v19, %v2598_v12  ;;  %v3746_v12 = vld [vmem:[%s5596_s1 + $0x39c] sm:$0xf] }
  0xae   :  { %1708 = vmatpush.bf16.msrb.mxu2 %v1397_v37  ;;  %1679 = vmatpush.bf16.msrb.mxu0 %v2979_v44  ;;  %v3678_v37 = vld [vmem:[%s5596_s1 + $0x174] sm:$0xf0]  ;;  %v3769_v44 = vld [vmem:[%s5596_s1 + $0x454] sm:$0xf]  ;;  %v5099_v22 = vpop.f32.mrf.mxu3  ;;  %v2887_v30 = vor.u32 %v3726_v21, %v2886_v20 }
  0xaf   :  { %v2695_v47 = vor.u32 %v3678_v37, %v2694_v34  ;;  %v3806_v31 = vld [vmem:[%s5596_s1 + $0x574] sm:$0xf0] }
  0xb0   :  { %1692 = vmatpush.bf16.msrb.mxu1 %v3235_v51  ;;  %1670 = vmatpush.bf16.msrb.mxu3 %v2595_v62  ;;  %v3072_v51 = vld [vmem:[%s5596_s1 + $0x470] sm:$0xf0]  ;;  %v3646_v34 = vld [vmem:[%s5596_s1 + $0x74] sm:$0xf0] }
  0xb1   :  { %v3075_v55 = vor.u32 %v3769_v44, %v3072_v51  ;;  %v2854_v37 = vld [vmem:[%s5596_s1 + $0x298] sm:$0xf] }
  0xb2   :  { %1709 = vmatpush.bf16.msrb.mxu2 %v3363_v49  ;;  %1680 = vmatpush.bf16.msrb.mxu0 %v2947_v58  ;;  %v2662_v49 = vld [vmem:[%s5596_s1 + $0x118] sm:$0xf]  ;;  %v2784_v58 = vld [vmem:[%s5596_s1 + $0x230] sm:$0xf0] }
  0xb3   :  { %v2663_v62 = vor.u32 %v3670_v50, %v2662_v49  ;;  %v2787_v8 = vor.u32 %v3697_v57, %v2784_v58  ;;  %v3718_v38 = vld [vmem:[%s5596_s1 + $0x2b4] sm:$0xf0]  ;;  %v3754_v57 = vld [vmem:[%s5596_s1 + $0x3dc] sm:$0xf] }
  0xb4   :  { %1693 = vmatpush.bf16.msrb.mxu1 %v3203_v59  ;;  %1671 = vmatpush.bf16.msrb.mxu3 %v2563_v13  ;;  %v3761_v59 = vld [vmem:[%s5596_s1 + $0x414] sm:$0xf]  ;;  %v3238_v13 = vld [vmem:[%s5596_s1 + $0x598] sm:$0xf]  ;;  %v2855_v46 = vor.u32 %v3718_v38, %v2854_v37  ;;  %v3016_v58 = vld [vmem:[%s5596_s1 + $0x3f8] sm:$0xf0]  ;;  %v932_v37 = vunpack.c.h.b16 %v5005_v35 }
  0xb5   :  { %v3043_v9 = vor.u32 %v3761_v59, %v3040_v60  ;;  %v3239_v23 = vor.u32 %v3814_v15, %v3238_v13  ;;  %v2534_v42 = vld [vmem:[%s5596_s1 + $0x18] sm:$0xf]  ;;  %v3019_v5 = vor.u32 %v3754_v57, %v3016_v58  ;;  %v2984_v13 = vld [vmem:[%s5596_s1 + $0x3b8] sm:$0xf0] }
  0xb6   :  { %1710 = vmatpush.bf16.msrb.mxu2 %v3331_v63  ;;  %1681 = vmatpush.bf16.msrb.mxu0 %v2915_v10  ;;  %v2951_v63 = vor.u32 %v3742_v53, %v2950_v52  ;;  %v3271_v10 = vor.u32 %v3822_v2, %v3270_v1  ;;  %v3638_v43 = vld [vmem:[%s5596_s1 + $0x34] sm:$0xf0]  ;;  %v3690_v53 = vld [vmem:[%s5596_s1 + $0x1dc] sm:$0xf]  ;;  %v2987_v21 = vor.u32 %v3746_v12, %v2984_v13 }
  0xb7   :  { %v3174_v44 = vld [vmem:[%s5596_s1 + $0x518] sm:$0xf]  ;;  %v3272_v15 = vld [vmem:[%s5596_s1 + $0x5f8] sm:$0xf0] }
  0xb8   :  { %1694 = vmatpush.bf16.msrb.mxu1 %v3171_v11  ;;  %1672 = vmatpush.bf16.msrb.mxu3 %v2531_v28  ;;  %v1400_v11 = vand.u32 %v4013_v26, %v1155_v61  ;;  %v5107_v27 = vpop.f32.mrf.mxu0  ;;  %v5109_v28 = vpop.f32.mrf.mxu1  ;;  %v3830_v49 = vld [vmem:[%s5596_s1 + $0x634] sm:$0xf0]  ;;  %v2920_v35 = vld [vmem:[%s5596_s1 + $0x338] sm:$0xf0] }
  0xb9   :  { %v2822_v50 = vld [vmem:[%s5596_s1 + $0x258] sm:$0xf]  ;;  %v3714_v12 = vld [vmem:[%s5596_s1 + $0x29c] sm:$0xf] }
  0xba   :  { %1711 = vmatpush.bf16.msrb.mxu2 %v3299_v14  ;;  %1682 = vmatpush.bf16.msrb.mxu0 %v2883_v18  ;;  %v2631_v14 = vor.u32 %v3662_v3, %v2630_v0  ;;  %v2566_v18 = vld [vmem:[%s5596_s1 + $0x58] sm:$0xf]  ;;  %v2856_v13 = vld [vmem:[%s5596_s1 + $0x2b8] sm:$0xf0] }
  0xbb   :  { %1673 = vmatmul.bf16.vlgmr.msrb.gmra.mxu3 %v4225_v4  ;;  %v2567_v51 = vor.u32 %v3646_v34, %v2566_v18  ;;  %v3710_v52 = vld [vmem:[%s5596_s1 + $0x274] sm:$0xf0]  ;;  %v2696_v18 = vld [vmem:[%s5596_s1 + $0x178] sm:$0xf0] }
  0xbc   :  { %1695 = vmatpush.bf16.msrb.mxu1 %v3139_v25  ;;  %1730 = vmatpush.bf16.msra.mxu3 %v3015_v33  ;;  %v3206_v25 = vld [vmem:[%s5596_s1 + $0x558] sm:$0xf]  ;;  %v2823_v0 = vor.u32 %v3710_v52, %v2822_v50  ;;  %v1156_v52 = vpack.c.b16 %v932_v37, %v932_v37 }
  0xbd   :  { %3377 = vmatmul.msk.bf16.vlgmr.msrb.gmra.mxu2 %vm1373_vm2, %v4173_v45  ;;  %v3838_v33 = vld [vmem:[%s5596_s1 + $0x674] sm:$0xf0] }
  0xbe   :  { %1717 = vmatpush.bf16.msra.mxu2 %v2759_v17  ;;  %1683 = vmatpush.bf16.msrb.mxu0 %v2851_v40  ;;  %v3846_v17 = vld [vmem:[%s5596_s1 + $0x6b4] sm:$0xf0]  ;;  %v3207_v40 = vor.u32 %v3806_v31, %v3206_v25  ;;  %v3738_v25 = vld [vmem:[%s5596_s1 + $0x35c] sm:$0xf] }
  0xbf   :  { %v3367_v24 = vor.u32 %v3846_v17, %v3366_v16  ;;  %v3142_v1 = vld [vmem:[%s5596_s1 + $0x4d8] sm:$0xf]  ;;  %v3810_v31 = vld [vmem:[%s5596_s1 + $0x59c] sm:$0xf] }
  0xc0   :  { %1696 = vmatpush.bf16.msrb.mxu1 %v3107_v41  ;;  %1731 = vmatpush.bf16.msra.mxu3 %v2983_v48  ;;  %v5131_v39 = vpop.f32.mrf.mxu2  ;;  %v3302_v48 = vld [vmem:[%s5596_s1 + $0x618] sm:$0xf]  ;;  %v1429_v61 = vpop.f32.mrf.mxu1 }
  0xc1   :  { %v3303_v60 = vor.u32 %v3830_v49, %v3302_v48  ;;  %v3790_v2 = vld [vmem:[%s5596_s1 + $0x4f4] sm:$0xf0]  ;;  %v3208_v48 = vld [vmem:[%s5596_s1 + $0x578] sm:$0xf0] }
  0xc2   :  { %1718 = vmatpush.bf16.msra.mxu2 %v2727_v32  ;;  %1684 = vmatpush.bf16.msrb.mxu0 %v2819_v54  ;;  %v3334_v32 = vld [vmem:[%s5596_s1 + $0x658] sm:$0xf]  ;;  %v1455_v54 = vpop.f32.mrf.mxu3  ;;  %v2888_v61 = vld [vmem:[%s5596_s1 + $0x2f8] sm:$0xf0] }
  0xc3   :  { %v3335_v41 = vor.u32 %v3838_v33, %v3334_v32  ;;  %v2790_v6 = vld [vmem:[%s5596_s1 + $0x218] sm:$0xf]  ;;  %v3240_v32 = vld [vmem:[%s5596_s1 + $0x5b8] sm:$0xf0] }
  0xc4   :  { %1697 = vmatpush.bf16.msrb.mxu1 %v3075_v55  ;;  %1732 = vmatpush.bf16.msra.mxu3 %v2951_v63  ;;  %v2760_v55 = vld [vmem:[%s5596_s1 + $0x1f8] sm:$0xf0]  ;;  %v2535_v63 = vor.u32 %v3638_v43, %v2534_v42  ;;  %v3110_v17 = vld [vmem:[%s5596_s1 + $0x498] sm:$0xf]  ;;  %v3243_v42 = vor.u32 %v3810_v31, %v3240_v32 }
  0xc5   :  { %v2763_v3 = vor.u32 %v3690_v53, %v2760_v55  ;;  %v3782_v19 = vld [vmem:[%s5596_s1 + $0x4b4] sm:$0xf0]  ;;  %v2664_v43 = vld [vmem:[%s5596_s1 + $0x138] sm:$0xf0] }
  0xc6   :  { %1719 = vmatpush.bf16.msra.mxu2 %v2695_v47  ;;  %1685 = vmatpush.bf16.msrb.mxu0 %v2787_v8  ;;  %v3798_v47 = vld [vmem:[%s5596_s1 + $0x534] sm:$0xf0]  ;;  %v3658_v55 = vld [vmem:[%s5596_s1 + $0xdc] sm:$0xf] }
  0xc7   :  { %v3175_v59 = vor.u32 %v3798_v47, %v3174_v44  ;;  %v3702_v8 = vld [vmem:[%s5596_s1 + $0x234] sm:$0xf0]  ;;  %v3730_v44 = vld [vmem:[%s5596_s1 + $0x31c] sm:$0xf] }
  0xc8   :  { %1698 = vmatpush.bf16.msrb.mxu1 %v3043_v9  ;;  %1733 = vmatpush.bf16.msra.mxu3 %v2919_v36  ;;  %v3682_v9 = vld [vmem:[%s5596_s1 + $0x19c] sm:$0xf]  ;;  %v2791_v16 = vor.u32 %v3702_v8, %v2790_v6  ;;  %v3078_v33 = vld [vmem:[%s5596_s1 + $0x458] sm:$0xf]  ;;  %v2923_v54 = vor.u32 %v3730_v44, %v2920_v35 }
  0xc9   :  { %1686 = vmatmul.bf16.vlgmr.msrb.gmra.mxu0 %v4231_v7  ;;  %v3818_v36 = vld [vmem:[%s5596_s1 + $0x5dc] sm:$0xf]  ;;  %v3774_v34 = vld [vmem:[%s5596_s1 + $0x474] sm:$0xf0] }
  0xca   :  { %1720 = vmatpush.bf16.msra.mxu2 %v2663_v62  ;;  %1743 = vmatpush.bf16.msra.mxu0 %v3271_v10  ;;  %v1416_v62 = vpop.f32.mrf.mxu0  ;;  %v1442_v10 = vpop.f32.mrf.mxu2  ;;  %v3802_v47 = vld [vmem:[%s5596_s1 + $0x55c] sm:$0xf]  ;;  %v3046_v49 = vld [vmem:[%s5596_s1 + $0x418] sm:$0xf] }
  0xcb   :  { %1699 = vmatmul.bf16.vlgmr.msrb.gmra.mxu1 %v4199_v56  ;;  %v3766_v50 = vld [vmem:[%s5596_s1 + $0x434] sm:$0xf0]  ;;  %v3211_v58 = vor.u32 %v3802_v47, %v3208_v48  ;;  %v3650_v6 = vld [vmem:[%s5596_s1 + $0x9c] sm:$0xf] }
  0xcc   :  { %1760 = vmatpush.bf16.msra.mxu1 %v1400_v11  ;;  %1734 = vmatpush.bf16.msra.mxu3 %v2887_v30  ;;  %v2728_v11 = vld [vmem:[%s5596_s1 + $0x1b8] sm:$0xf0]  ;;  %v3111_v30 = vor.u32 %v3782_v19, %v3110_v17  ;;  %v3047_v62 = vor.u32 %v3766_v50, %v3046_v49  ;;  %v2859_v19 = vor.u32 %v3714_v12, %v2856_v13  ;;  %v3877_v13 = vld [vmem:[%s5598_s3 + $0xf0] sm:$0xff] }
  0xcd   :  { %v2731_v20 = vor.u32 %v3682_v9, %v2728_v11  ;;  %v3842_v8 = vld [vmem:[%s5596_s1 + $0x69c] sm:$0xf] }
  0xce   :  { %1721 = vmatpush.bf16.msra.mxu2 %v2631_v14  ;;  %1744 = vmatpush.bf16.msra.mxu0 %v3239_v23  ;;  %v3143_v14 = vor.u32 %v3790_v2, %v3142_v1  ;;  %v3674_v23 = vld [vmem:[%s5596_s1 + $0x15c] sm:$0xf]  ;;  %v5263_v57 = vpop.f32.mrf.mxu3  ;;  %v1403_v1 = vand.u32 %v4013_v26, %v1156_v52 }
  0xcf   :  { %v2699_v38 = vor.u32 %v3674_v23, %v2696_v18  ;;  %v3368_v9 = vld [vmem:[%s5596_s1 + $0x6b8] sm:$0xf0] }
  0xd0   :  { %1761 = vmatpush.bf16.msra.mxu1 %v3367_v24  ;;  %1735 = vmatpush.bf16.msra.mxu3 %v2855_v46  ;;  %v3275_v24 = vor.u32 %v3818_v36, %v3272_v15  ;;  %v3079_v46 = vor.u32 %v3774_v34, %v3078_v33  ;;  %v2600_v11 = vld [vmem:[%s5596_s1 + $0xb8] sm:$0xf0] }
  0xd1   :  { %v3786_v36 = vld [vmem:[%s5596_s1 + $0x4dc] sm:$0xf]  ;;  %v2603_v17 = vor.u32 %v3650_v6, %v2600_v11 }
  0xd2   :  { %1722 = vmatpush.bf16.msra.mxu2 %v2599_v29  ;;  %1745 = vmatpush.bf16.msra.mxu0 %v3207_v40  ;;  %v2952_v29 = vld [vmem:[%s5596_s1 + $0x378] sm:$0xf0] }
  0xd3   :  { %v2955_v40 = vor.u32 %v3738_v25, %v2952_v29  ;;  %v3144_v15 = vld [vmem:[%s5596_s1 + $0x4f8] sm:$0xf0] }
  0xd4   :  { %1762 = vmatpush.bf16.msra.mxu1 %v3335_v41  ;;  %1736 = vmatpush.bf16.msra.mxu3 %v2823_v0  ;;  %v3666_v41 = vld [vmem:[%s5596_s1 + $0x11c] sm:$0xf]  ;;  %v3147_v18 = vor.u32 %v3786_v36, %v3144_v15  ;;  %v3851_v36 = vld [vmem:[%s5598_s3 + $0x20] sm:$0xff] }
  0xd5   :  { %v2667_v53 = vor.u32 %v3666_v41, %v2664_v43  ;;  %v3176_v0 = vld [vmem:[%s5596_s1 + $0x538] sm:$0xf0] }
  0xd6   :  { %1723 = vmatpush.bf16.msra.mxu2 %v2567_v51  ;;  %1746 = vmatpush.bf16.msra.mxu0 %v3175_v59  ;;  %v5245_v51 = vpop.f32.mrf.mxu2  ;;  %v2632_v59 = vld [vmem:[%s5596_s1 + $0xf8] sm:$0xf0]  ;;  %v5281_v2 = vpop.f32.mrf.mxu0 }
  0xd7   :  { %v3336_v23 = vld [vmem:[%s5596_s1 + $0x678] sm:$0xf0] }
  0xd8   :  { %1763 = vmatpush.bf16.msra.mxu1 %v3303_v60  ;;  %1737 = vmatpush.bf16.msra.mxu3 %v2791_v16  ;;  %v3722_v60 = vld [vmem:[%s5596_s1 + $0x2dc] sm:$0xf]  ;;  %v5292_v10 = vpop.f32.mrf.mxu1  ;;  %v3371_v16 = vor.u32 %v3842_v8, %v3368_v9  ;;  %v3852_v9 = vld [vmem:[%s5598_s3 + $0x28] sm:$0xff] }
  0xd9   :  { %v2568_v25 = vld [vmem:[%s5596_s1 + $0x78] sm:$0xf0] }
  0xda   :  { %1724 = vmatpush.bf16.msra.mxu2 %v2535_v63  ;;  %1747 = vmatpush.bf16.msra.mxu0 %v3143_v14  ;;  %v3794_v63 = vld [vmem:[%s5596_s1 + $0x51c] sm:$0xf] }
  0xdb   :  { %3378 = vmatmul.msk.bf16.vlgmr.msra.gmra.mxu1 %vm1373_vm2, %v4173_v45  ;;  %1738 = vmatmul.bf16.vlgmr.msra.gmra.mxu3 %v4231_v7  ;;  %v3179_v26 = vor.u32 %v3794_v63, %v3176_v0  ;;  %v3706_v29 = vld [vmem:[%s5596_s1 + $0x25c] sm:$0xf]  ;;  %v3853_v0 = vld [vmem:[%s5598_s3 + $0x30] sm:$0xff] }
  0xdc   :  { %1769 = vmatpush.bf16.msrb.mxu1 %v2763_v3  ;;  %1795 = vmatpush.bf16.msrb.mxu3 %v3275_v24  ;;  %v2635_v3 = vor.u32 %v3658_v55, %v2632_v59  ;;  %v1468_v24 = vpop.f32.mrf.mxu3  ;;  %v3778_v31 = vld [vmem:[%s5596_s1 + $0x49c] sm:$0xf] }
  0xdd   :  { %1725 = vmatmul.bf16.vlgmr.msra.gmra.mxu2 %v4225_v4  ;;  %v3112_v32 = vld [vmem:[%s5596_s1 + $0x4b8] sm:$0xf0] }
  0xde   :  { %1782 = vmatpush.bf16.msrb.mxu2 %v3019_v5  ;;  %1748 = vmatpush.bf16.msra.mxu0 %v3111_v30  ;;  %v2891_v5 = vor.u32 %v3722_v60, %v2888_v61  ;;  %v1507_v14 = vpop.f32.mrf.mxu2  ;;  %v2824_v30 = vld [vmem:[%s5596_s1 + $0x278] sm:$0xf0]  ;;  %v1481_v34 = vpop.f32.mrf.mxu0  ;;  %v3115_v44 = vor.u32 %v3778_v31, %v3112_v32 }
  0xdf   :  { %v3826_v41 = vld [vmem:[%s5596_s1 + $0x61c] sm:$0xf] }
  0xe0   :  { %1770 = vmatpush.bf16.msrb.mxu1 %v2731_v20  ;;  %1796 = vmatpush.bf16.msrb.mxu3 %v3243_v42  ;;  %v3642_v20 = vld [vmem:[%s5596_s1 + $0x5c] sm:$0xf]  ;;  %v1494_v43 = vpop.f32.mrf.mxu1 }
  0xe1   :  { %v2571_v37 = vor.u32 %v3642_v20, %v2568_v25  ;;  %v3304_v42 = vld [vmem:[%s5596_s1 + $0x638] sm:$0xf0]  ;;  %v3876_v20 = vld [vmem:[%s5598_s3 + $0xe8] sm:$0xff] }
  0xe2   :  { %1783 = vmatpush.bf16.msrb.mxu2 %v2987_v21  ;;  %1749 = vmatpush.bf16.msra.mxu0 %v3079_v46  ;;  %v3834_v21 = vld [vmem:[%s5596_s1 + $0x65c] sm:$0xf]  ;;  %v3307_v50 = vor.u32 %v3826_v41, %v3304_v42  ;;  %v3848_v41 = vld [vmem:[%s5598_s3 + $0x8] sm:$0xff] }
  0xe3   :  { %v3339_v33 = vor.u32 %v3834_v21, %v3336_v23  ;;  %v2536_v35 = vld [vmem:[%s5596_s1 + $0x38] sm:$0xf0]  ;;  %v3864_v43 = vld [vmem:[%s5598_s3 + $0x88] sm:$0xff] }
  0xe4   :  { %1771 = vmatpush.bf16.msrb.mxu1 %v2699_v38  ;;  %1797 = vmatpush.bf16.msrb.mxu3 %v3211_v58  ;;  %v2827_v38 = vor.u32 %v3706_v29, %v2824_v30  ;;  %v3698_v46 = vld [vmem:[%s5596_s1 + $0x21c] sm:$0xf]  ;;  %v3875_v30 = vld [vmem:[%s5598_s3 + $0xe0] sm:$0xff] }
  0xe5   :  { %v2792_v47 = vld [vmem:[%s5596_s1 + $0x238] sm:$0xf0] }
  0xe6   :  { %1784 = vmatpush.bf16.msrb.mxu2 %v2955_v40  ;;  %1750 = vmatpush.bf16.msra.mxu0 %v3047_v62  ;;  %v3634_v40 = vld [vmem:[%s5596_s1 + $0x1c] sm:$0xf] }
  0xe7   :  { %v3770_v48 = vld [vmem:[%s5596_s1 + $0x45c] sm:$0xf]  ;;  %v2539_v52 = vor.u32 %v3634_v40, %v2536_v35  ;;  %v3873_v35 = vld [vmem:[%s5598_s3 + $0xd0] sm:$0xff] }
  0xe8   :  { %1772 = vmatpush.bf16.msrb.mxu1 %v2667_v53  ;;  %1798 = vmatpush.bf16.msrb.mxu3 %v3179_v26  ;;  %v3080_v49 = vld [vmem:[%s5596_s1 + $0x478] sm:$0xf0]  ;;  %v2795_v53 = vor.u32 %v3698_v46, %v2792_v47  ;;  %v5373_v62 = vpop.f32.mrf.mxu1 }
  0xe9   :  { %1751 = vmatmul.bf16.vlgmr.msra.gmra.mxu0 %v4199_v56  ;;  %v3854_v55 = vld [vmem:[%s5598_s3 + $0x38] sm:$0xff] }
  0xea   :  { %1785 = vmatpush.bf16.msrb.mxu2 %v2923_v54  ;;  %1812 = vmatpush.bf16.msrb.mxu0 %v1403_v1  ;;  %v3083_v54 = vor.u32 %v3770_v48, %v3080_v49  ;;  %v3862_v58 = vld [vmem:[%s5598_s3 + $0x78] sm:$0xff]  ;;  %v3861_v1 = vld [vmem:[%s5598_s3 + $0x70] sm:$0xff]  ;;  %v3855_v48 = vld [vmem:[%s5598_s3 + $0x40] sm:$0xff] }
  0xeb   :  { %v3870_v59 = vld [vmem:[%s5598_s3 + $0xb8] sm:$0xff] }
  0xec   :  { %1773 = vmatpush.bf16.msrb.mxu1 %v2635_v3  ;;  %1799 = vmatpush.bf16.msrb.mxu3 %v3147_v18  ;;  %v3762_v60 = vld [vmem:[%s5596_s1 + $0x41c] sm:$0xf]  ;;  %v3869_v3 = vld [vmem:[%s5598_s3 + $0xb0] sm:$0xff] }
  0xed   :  { %v3048_v61 = vld [vmem:[%s5596_s1 + $0x438] sm:$0xf0] }
  0xee   :  { %1786 = vmatpush.bf16.msrb.mxu2 %v2891_v5  ;;  %1813 = vmatpush.bf16.msrb.mxu0 %v3371_v16  ;;  %v3051_v63 = vor.u32 %v3762_v60, %v3048_v61  ;;  %v5387_v5 = vld [vmem:[%s5599_s2] sm:$0xff]  ;;  %v3878_v6 = vld [vmem:[%s5598_s3 + $0xf8] sm:$0xff] }
  0xef   :  { %v259_v26 = vperm.slane %v5387_v5, 2  ;;  %v257_v11 = vperm.slane %v5387_v5, 0  ;;  %v258_v12 = vperm.slane %v5387_v5, 1  ;;  %v3850_v23 = vld [vmem:[%s5598_s3 + $0x18] sm:$0xff] }
  0xf0   :  { %1774 = vmatpush.bf16.msrb.mxu1 %v2603_v17  ;;  %1800 = vmatpush.bf16.msrb.mxu3 %v3115_v44  ;;  %v1518_v8 = vpop.f32.mrf.mxu2  ;;  %v1559_v14 = vpop.f32.mrf.mxu1  ;;  %v3867_v17 = vld [vmem:[%s5598_s3 + $0xa0] sm:$0xff]  ;;  %v3866_v25 = vld [vmem:[%s5598_s3 + $0x98] sm:$0xff] }
  0xf1   :  { %v1519_v15 = vadd.f32 %v1518_v8, %v259_v26  ;;  %v1415_v16 = vadd.f32 %v5107_v27, %v257_v11  ;;  %v3884_v8 = vld [vmem:[%s5598_s3 + $0x128] sm:$0xff] }
  0xf2   :  { %1787 = vmatpush.bf16.msrb.mxu2 %v2859_v19  ;;  %1814 = vmatpush.bf16.msrb.mxu0 %v3339_v33  ;;  %v1467_v19 = vadd.f32 %v5263_v57, %v258_v12  ;;  %v3858_v57 = vld [vmem:[%s5598_s3 + $0x58] sm:$0xff]  ;;  %v3857_v33 = vld [vmem:[%s5598_s3 + $0x50] sm:$0xff] }
  0xf3   :  { %v1428_v18 = vadd.f32 %v5109_v28, %v1415_v16  ;;  %v3849_v28 = vld [vmem:[%s5598_s3 + $0x10] sm:$0xff]  ;;  %v3891_v16 = vld [vmem:[%s5598_s3 + $0x160] sm:$0xff] }
  0xf4   :  { %1775 = vmatpush.bf16.msrb.mxu1 %v2571_v37  ;;  %1801 = vmatpush.bf16.msrb.mxu3 %v3083_v54  ;;  %v1480_v29 = vadd.f32 %v5281_v2, %v1467_v19  ;;  %v3865_v2 = vld [vmem:[%s5598_s3 + $0x90] sm:$0xff]  ;;  %v3886_v54 = vld [vmem:[%s5598_s3 + $0x138] sm:$0xff] }
  0xf5   :  { %v1441_v32 = vadd.f32 %v5131_v39, %v1428_v18  ;;  %v3890_v19 = vld [vmem:[%s5598_s3 + $0x158] sm:$0xff] }
  0xf6   :  { %1788 = vmatpush.bf16.msrb.mxu2 %v2827_v38  ;;  %1815 = vmatpush.bf16.msrb.mxu0 %v3307_v50  ;;  %v1544_v27 = vpop.f32.mrf.mxu0  ;;  %v1493_v37 = vadd.f32 %v5292_v10, %v1480_v29  ;;  %v3874_v38 = vld [vmem:[%s5598_s3 + $0xd8] sm:$0xff]  ;;  %v3856_v10 = vld [vmem:[%s5598_s3 + $0x48] sm:$0xff] }
  0xf7   :  { %v1454_v42 = vadd.f32 %v5099_v22, %v1441_v32  ;;  %v3847_v22 = vld [vmem:[%s5598_s3] sm:$0xff]  ;;  %v3888_v29 = vld [vmem:[%s5598_s3 + $0x148] sm:$0xff] }
  0xf8   :  { %1776 = vmatpush.bf16.msrb.mxu1 %v2539_v52  ;;  %1802 = vmatpush.bf16.msrb.mxu3 %v3051_v63  ;;  %v1520_v21 = vpop.f32.mrf.mxu2  ;;  %v1506_v44 = vadd.f32 %v5245_v51, %v1493_v37  ;;  %v3863_v51 = vld [vmem:[%s5598_s3 + $0x80] sm:$0xff]  ;;  %v260_v52 = vperm.slane %v5387_v5, 3  ;;  %v3885_v63 = vld [vmem:[%s5598_s3 + $0x130] sm:$0xff] }
  0xf9   :  { %3379 = vmatmul.msk.bf16.vlgmr.msrb.gmra.mxu0 %vm1373_vm2, %v4173_v45  ;;  %v3859_v45 = vld [vmem:[%s5598_s3 + $0x60] sm:$0xff]  ;;  %v1821_v47 = vmax.f32 %v1454_v42, 0.0  ;;  %v261_v21 = vperm.slane %v5387_v5, 4  ;;  %v3901_v37 = vld [vmem:[%s5598_s3 + $0x1b0] sm:$0xff] }
  0xfa   :  { %1789 = vmatpush.bf16.msrb.mxu2 %v2795_v53  ;;  %2301 = vmatpush.bf16.msra.mxu0 %v3854_v55  ;;  %v1822_v50 = vmax.f32 %v1506_v44, 0.0  ;;  %v3872_v53 = vld [vmem:[%s5598_s3 + $0xc8] sm:$0xff]  ;;  %v3898_v44 = vld [vmem:[%s5598_s3 + $0x198] sm:$0xff] }
  0xfb   :  { %1777 = vmatmul.bf16.vlgmr.msrb.gmra.mxu1 %v4225_v4  ;;  %v3860_v4 = vld [vmem:[%s5598_s3 + $0x68] sm:$0xff]  ;;  %1803 = vmatmul.bf16.vlgmr.msrb.gmra.mxu3 %v4199_v56  ;;  %v1531_v56 = vpop.f32.mrf.mxu3 }
  0xfc   :  { %2314 = vmatpush.bf16.msra.mxu1 %v3862_v58  ;;  %2340 = vmatpush.bf16.msra.mxu3 %v3878_v6  ;;  %v1532_v24 = vadd.f32 %v1531_v56, %v1519_v15  ;;  %v1829_v58 = vpack.c.bf16 %v1821_v47, %v1821_v47  ;;  %v1830_v60 = vpack.c.bf16 %v1822_v50, %v1822_v50  ;;  %v3882_v15 = vld [vmem:[%s5598_s3 + $0x118] sm:$0xff]  ;;  %v3881_v56 = vld [vmem:[%s5598_s3 + $0x110] sm:$0xff] }
  0xfd   :  { %1790 = vmatmul.bf16.vlgmr.msrb.gmra.mxu2 %v4231_v7  ;;  %v3868_v7 = vld [vmem:[%s5598_s3 + $0xa8] sm:$0xff] }
  0xfe   :  { %2327 = vmatpush.bf16.msra.mxu2 %v3870_v59  ;;  %2302 = vmatpush.bf16.msra.mxu0 %v3853_v0  ;;  %v1545_v31 = vadd.f32 %v1544_v27, %v1532_v24  ;;  %v1546_v40 = vpop.f32.mrf.mxu0  ;;  %v3889_v27 = vld [vmem:[%s5598_s3 + $0x150] sm:$0xff]  ;;  %v3879_v24 = vld [vmem:[%s5598_s3 + $0x100] sm:$0xff] }
 0x100   :  { %2315 = vmatpush.bf16.msra.mxu1 %v3861_v1  ;;  %2341 = vmatpush.bf16.msra.mxu3 %v3877_v13  ;;  %v1558_v39 = vadd.f32 %v5373_v62, %v1545_v31  ;;  %v3871_v62 = vld [vmem:[%s5598_s3 + $0xc0] sm:$0xff]  ;;  %v3894_v1 = vld [vmem:[%s5598_s3 + $0x178] sm:$0xff]  ;;  %v3892_v13 = vld [vmem:[%s5598_s3 + $0x168] sm:$0xff] }
 0x101   :  { %v3887_v31 = vld [vmem:[%s5598_s3 + $0x140] sm:$0xff] }
 0x102   :  { %2328 = vmatpush.bf16.msra.mxu2 %v3869_v3  ;;  %2303 = vmatpush.bf16.msra.mxu0 %v3852_v9  ;;  %v1823_v46 = vmax.f32 %v1558_v39, 0.0  ;;  %v3893_v9 = vld [vmem:[%s5598_s3 + $0x170] sm:$0xff]  ;;  %v3900_v39 = vld [vmem:[%s5598_s3 + $0x1a8] sm:$0xff] }
 0x103   :  { %v1533_v34 = vpop.f32.mrf.mxu3 }
 0x104   :  { %2316 = vmatpush.bf16.msra.mxu1 %v3860_v4  ;;  %2342 = vmatpush.bf16.msra.mxu3 %v3876_v20  ;;  %v1831_v55 = vpack.c.bf16 %v1823_v46, %v1823_v46  ;;  %v3880_v20 = vld [vmem:[%s5598_s3 + $0x108] sm:$0xff]  ;;  %v3897_v46 = vld [vmem:[%s5598_s3 + $0x190] sm:$0xff] }
 0x106   :  { %2329 = vmatpush.bf16.msra.mxu2 %v3868_v7  ;;  %2304 = vmatpush.bf16.msra.mxu0 %v3851_v36  ;;  %v1609_v59 = vpop.f32.mrf.mxu0  ;;  %v3883_v7 = vld [vmem:[%s5598_s3 + $0x120] sm:$0xff] }
 0x108   :  { %2317 = vmatpush.bf16.msra.mxu1 %v3859_v45  ;;  %2343 = vmatpush.bf16.msra.mxu3 %v3875_v30  ;;  %v1570_v49 = vpop.f32.mrf.mxu1 }
 0x109   :  { %v1571_v61 = vadd.f32 %v1570_v49, %v260_v52 }
 0x10a   :  { %2330 = vmatpush.bf16.msra.mxu2 %v3867_v17  ;;  %2305 = vmatpush.bf16.msra.mxu0 %v3850_v23 }
 0x10c   :  { %2318 = vmatpush.bf16.msra.mxu1 %v3858_v57  ;;  %2344 = vmatpush.bf16.msra.mxu3 %v3874_v38 }
 0x10e   :  { %2331 = vmatpush.bf16.msra.mxu2 %v3866_v25  ;;  %2306 = vmatpush.bf16.msra.mxu0 %v3849_v28  ;;  %v1596_v26 = vpop.f32.mrf.mxu3  ;;  %v1611_v11 = vpop.f32.mrf.mxu0  ;;  %v3902_v28 = vld [vmem:[%s5598_s3 + $0x1b8] sm:$0xff] }
 0x110   :  { %2319 = vmatpush.bf16.msra.mxu1 %v3857_v33  ;;  %2345 = vmatpush.bf16.msra.mxu3 %v3873_v35  ;;  %v1583_v0 = vpop.f32.mrf.mxu2  ;;  %v1572_v3 = vpop.f32.mrf.mxu1  ;;  %v262_v35 = vperm.slane %v5387_v5, 5 }
 0x111   :  { %v1584_v6 = vadd.f32 %v1583_v0, %v1571_v61  ;;  %v1949_v0 = vld [vmem:[%s5598_s3 + $0x1c0] sm:$0x3] }
 0x112   :  { %2332 = vmatpush.bf16.msra.mxu2 %v3865_v2  ;;  %2307 = vmatpush.bf16.msra.mxu0 %v3848_v41 }
 0x113   :  { %v1597_v4 = vadd.f32 %v1596_v26, %v1584_v6 }
 0x114   :  { %2320 = vmatpush.bf16.msra.mxu1 %v3856_v10  ;;  %2346 = vmatpush.bf16.msra.mxu3 %v3872_v53 }
 0x115   :  { %v1610_v14 = vadd.f32 %v1609_v59, %v1597_v4 }
 0x116   :  { %2333 = vmatpush.bf16.msra.mxu2 %v3864_v43  ;;  %2308 = vmatpush.bf16.msra.mxu0 %v3847_v22  ;;  %v1598_v17 = vpop.f32.mrf.mxu3  ;;  %v3899_v43 = vld [vmem:[%s5598_s3 + $0x1a0] sm:$0xff] }
 0x117   :  { %v1824_v36 = vmax.f32 %v1610_v14, 0.0 }
 0x118   :  { %2321 = vmatpush.bf16.msra.mxu1 %v3855_v48  ;;  %2347 = vmatpush.bf16.msra.mxu3 %v3871_v62  ;;  %v1585_v12 = vpop.f32.mrf.mxu2 }
 0x119   :  { %2309 = vmatmul.bf16.vlgmr.msra.gmra.mxu0 %v1829_v58  ;;  %v1832_v45 = vpack.c.bf16 %v1824_v36, %v1824_v36 }
 0x11a   :  { %2334 = vmatpush.bf16.msra.mxu2 %v3863_v51  ;;  %2353 = vmatpush.bf16.msrb.mxu0 %v3886_v54  ;;  %v3896_v51 = vld [vmem:[%s5598_s3 + $0x188] sm:$0xff] }
 0x11b   :  { %2322 = vmatmul.bf16.vlgmr.msra.gmra.mxu1 %v1830_v60  ;;  %2348 = vmatmul.bf16.vlgmr.msra.gmra.mxu3 %v1832_v45 }
 0x11c   :  { %2366 = vmatpush.bf16.msrb.mxu1 %v3894_v1  ;;  %v2179_v1 = vunpack.c.l.b16 %v1949_v0 }
 0x11d   :  { %2335 = vmatmul.bf16.vlgmr.msra.gmra.mxu2 %v1831_v55  ;;  %v3895_v55 = vld [vmem:[%s5598_s3 + $0x180] sm:$0xff] }
 0x11e   :  { %2354 = vmatpush.bf16.msrb.mxu0 %v3885_v63  ;;  %v1661_v23 = vpop.f32.mrf.mxu3  ;;  %2379 = vmatpush.bf16.msrb.mxu2 %v3902_v28  ;;  %v2236_v3 = vpack.c.b16 %v2179_v1, %v2179_v1 }
 0x120   :  { %2367 = vmatpush.bf16.msrb.mxu1 %v3893_v9  ;;  %v263_v9 = vperm.slane %v5387_v5, 6 }
 0x122   :  { %2355 = vmatpush.bf16.msrb.mxu0 %v3884_v8  ;;  %2380 = vmatpush.bf16.msrb.mxu2 %v3901_v37  ;;  %v2299_v8 = vsel %vm2297_vm3, %v2236_v3, 0 }
 0x123   :  { %2399 = vmatpush.bf16.msrb.mxu3 %v2299_v8 }
 0x124   :  { %2368 = vmatpush.bf16.msrb.mxu1 %v3892_v13 }
 0x126   :  { %2356 = vmatpush.bf16.msrb.mxu0 %v3883_v7  ;;  %v1622_v18 = vpop.f32.mrf.mxu0  ;;  %v1663_v33 = vpop.f32.mrf.mxu3  ;;  %2381 = vmatpush.bf16.msrb.mxu2 %v3900_v39 }
 0x127   :  { %v1623_v57 = vadd.f32 %v1622_v18, %v261_v21 }
 0x128   :  { %2369 = vmatpush.bf16.msrb.mxu1 %v3891_v16  ;;  %v1635_v25 = vpop.f32.mrf.mxu1 }
 0x129   :  { %v1636_v30 = vadd.f32 %v1635_v25, %v1623_v57 }
 0x12a   :  { %2357 = vmatpush.bf16.msrb.mxu0 %v3882_v15  ;;  %2382 = vmatpush.bf16.msrb.mxu2 %v3899_v43 }
 0x12c   :  { %2370 = vmatpush.bf16.msrb.mxu1 %v3890_v19  ;;  %v264_v19 = vperm.slane %v5387_v5, 7  ;;  %v3910_v5 = vld [vmem:[%s5600_s4] ss:$0 sm:$0xff] }
 0x12e   :  { %2358 = vmatpush.bf16.msrb.mxu0 %v3881_v56  ;;  %v1624_v34 = vpop.f32.mrf.mxu0  ;;  %2383 = vmatpush.bf16.msrb.mxu2 %v3898_v44 }
 0x130   :  { %2371 = vmatpush.bf16.msrb.mxu1 %v3889_v27  ;;  %v1648_v32 = vpop.f32.mrf.mxu2  ;;  %v1637_v40 = vpop.f32.mrf.mxu1 }
 0x131   :  { %v1649_v2 = vadd.f32 %v1648_v32, %v1636_v30 }
 0x132   :  { %2359 = vmatpush.bf16.msrb.mxu0 %v3880_v20  ;;  %2384 = vmatpush.bf16.msrb.mxu2 %v3897_v46 }
 0x133   :  { %v1662_v38 = vadd.f32 %v1661_v23, %v1649_v2 }
 0x134   :  { %2372 = vmatpush.bf16.msrb.mxu1 %v3888_v29 }
 0x135   :  { %v1825_v41 = vmax.f32 %v1662_v38, 0.0 }
 0x136   :  { %2360 = vmatpush.bf16.msrb.mxu0 %v3879_v24  ;;  %2385 = vmatpush.bf16.msrb.mxu2 %v3896_v51  ;;  %v2419_v51 = vld [vmem:[%s5602_s5 + $0x30] sm:$0x3] }
 0x137   :  { %v1833_v42 = vpack.c.bf16 %v1825_v41, %v1825_v41 }
 0x138   :  { %2373 = vmatpush.bf16.msrb.mxu1 %v3887_v31  ;;  %v1650_v10 = vpop.f32.mrf.mxu2 }
 0x139   :  { %2361 = vmatmul.bf16.vlgmr.msrb.gmra.mxu0 %v1833_v42 }
 0x13a   :  { %2386 = vmatpush.bf16.msrb.mxu2 %v3895_v55  ;;  %v3907_v55 = vld [vmem:[%s5602_s5 + $0x20] sm:$0xff] }
 0x13e   :  { %v1674_v47 = vpop.f32.mrf.mxu3 }
 0x13f   :  { %v1675_v48 = vadd.f32 %v1674_v47, %v262_v35 }
 0x140   :  { %v1713_v22 = vpop.f32.mrf.mxu2 }
 0x146   :  { %v1687_v49 = vpop.f32.mrf.mxu0  ;;  %v1676_v58 = vpop.f32.mrf.mxu3 }
 0x147   :  { %v1688_v52 = vadd.f32 %v1687_v49, %v1675_v48  ;;  %v2449_v49 = vunpack.c.l.b16 %v2419_v51  ;;  %v3906_v58 = vld [vmem:[%s5602_s5 + $0x18] sm:$0xff] }
 0x148   :  { %v1700_v50 = vpop.f32.mrf.mxu1  ;;  %v1715_v53 = vpop.f32.mrf.mxu2 }
 0x149   :  { %v1701_v54 = vadd.f32 %v1700_v50, %v1688_v52  ;;  %v2456_v50 = vpack.c.b16 %v2449_v49, %v2449_v49  ;;  %v3908_v53 = vld [vmem:[%s5602_s5 + $0x28] sm:$0xff] }
 0x14b   :  { %v1714_v59 = vadd.f32 %v1713_v22, %v1701_v54  ;;  %v2468_v52 = vsel %vm2297_vm3, %v2456_v50, 0 }
 0x14c   :  { %2471 = vmatpush.bf16.msra.mxu3 %v2468_v52 }
 0x14d   :  { %v1826_v60 = vmax.f32 %v1714_v59, 0.0  ;;  %v3905_v59 = vld [vmem:[%s5602_s5 + $0x10] sm:$0xff] }
 0x14e   :  { %v1689_v62 = vpop.f32.mrf.mxu0 }
 0x14f   :  { %v1834_v63 = vpack.c.bf16 %v1826_v60, %v1826_v60  ;;  %v3904_v60 = vld [vmem:[%s5602_s5 + $0x8] sm:$0xff] }
 0x150   :  { %v1702_v61 = vpop.f32.mrf.mxu1  ;;  %2472 = vmatpush.bf16.msra.mxu3 %v3908_v53 }
 0x151   :  { %2374 = vmatmul.bf16.vlgmr.msrb.gmra.mxu1 %v1834_v63  ;;  %v3903_v61 = vld [vmem:[%s5602_s5] sm:$0xff] }
 0x154   :  { %2473 = vmatpush.bf16.msra.mxu3 %v3907_v55 }
 0x158   :  { %v1765_v6 = vpop.f32.mrf.mxu1  ;;  %2474 = vmatpush.bf16.msra.mxu3 %v3906_v58 }
 0x15c   :  { %2475 = vmatpush.bf16.msra.mxu3 %v3905_v59 }
 0x15e   :  { %v1739_v4 = vpop.f32.mrf.mxu3 }
 0x160   :  { %v1726_v26 = vpop.f32.mrf.mxu2  ;;  %v1767_v7 = vpop.f32.mrf.mxu1  ;;  %2476 = vmatpush.bf16.msra.mxu3 %v3904_v60 }
 0x161   :  { %v1727_v11 = vadd.f32 %v1726_v26, %v263_v9 }
 0x163   :  { %v1740_v12 = vadd.f32 %v1739_v4, %v1727_v11  ;;  %v3911_v11 = vld [vmem:[%s5601_s6] ss:$0 sm:$0xff] }
 0x164   :  { %2477 = vmatpush.bf16.msra.mxu3 %v3903_v61 }
 0x166   :  { %v1752_v14 = vpop.f32.mrf.mxu0  ;;  %v1741_v16 = vpop.f32.mrf.mxu3 }
 0x167   :  { %v1753_v36 = vadd.f32 %v1752_v14, %v1740_v12 }
 0x168   :  { %v1728_v13 = vpop.f32.mrf.mxu2 }
 0x169   :  { %v1766_v15 = vadd.f32 %v1765_v6, %v1753_v36 }
 0x16b   :  { %v1827_v45 = vmax.f32 %v1766_v15, 0.0 }
 0x16d   :  { %v1835_v17 = vpack.c.bf16 %v1827_v45, %v1827_v45 }
 0x16e   :  { %v1754_v56 = vpop.f32.mrf.mxu0 }
 0x16f   :  { %2387 = vmatmul.bf16.vlgmr.msrb.gmra.mxu2 %v1835_v17 }
 0x176   :  { %v1817_v27 = vpop.f32.mrf.mxu0 }
 0x178   :  { %v1778_v20 = vpop.f32.mrf.mxu1 }
 0x179   :  { %v1779_v21 = vadd.f32 %v1778_v20, %v264_v19 }
 0x17e   :  { %v1804_v57 = vpop.f32.mrf.mxu3  ;;  %v1819_v29 = vpop.f32.mrf.mxu0 }
 0x180   :  { %v1791_v23 = vpop.f32.mrf.mxu2  ;;  %v1780_v18 = vpop.f32.mrf.mxu1 }
 0x181   :  { %v1792_v24 = vadd.f32 %v1791_v23, %v1779_v21 }
 0x183   :  { %v1805_v25 = vadd.f32 %v1804_v57, %v1792_v24 }
 0x185   :  { %v1818_v30 = vadd.f32 %v1817_v27, %v1805_v25 }
 0x186   :  { %v1806_v33 = vpop.f32.mrf.mxu3 }
 0x187   :  { %v1828_v31 = vmax.f32 %v1818_v30, 0.0 }
 0x188   :  { %v1793_v28 = vpop.f32.mrf.mxu2 }
 0x189   :  { %v1836_v32 = vpack.c.bf16 %v1828_v31, %v1828_v31 }
 0x18b   :  { %3604 = vmatmul.msk.bf16.vlgmr.msrb.gmra.mxu3 %vm2293_vm4, %v1836_v32 }
 0x196   :  { %v2310_v2 = vpop.f32.mrf.mxu0 }
 0x197   :  { %v2311_v34 = vadd.f32 %v3910_v5, %v2310_v2 }
 0x198   :  { %v2323_v37 = vpop.f32.mrf.mxu1 }
 0x199   :  { %v2324_v38 = vadd.f32 %v2323_v37, %v2311_v34 }
 0x19e   :  { %v2312_v41 = vpop.f32.mrf.mxu0  ;;  %v2349_v43 = vpop.f32.mrf.mxu3 }
 0x1a0   :  { %v2336_v40 = vpop.f32.mrf.mxu2  ;;  %v2325_v42 = vpop.f32.mrf.mxu1 }
 0x1a1   :  { %v2337_v39 = vadd.f32 %v2336_v40, %v2324_v38 }
 0x1a3   :  { %v2350_v44 = vadd.f32 %v2349_v43, %v2337_v39 }
 0x1a6   :  { %v2351_v35 = vpop.f32.mrf.mxu3 }
 0x1a8   :  { %v2338_v10 = vpop.f32.mrf.mxu2 }
 0x1b6   :  { %v2362_v46 = vpop.f32.mrf.mxu0 }
 0x1b7   :  { %v2363_v22 = vadd.f32 %v2362_v46, %v2350_v44 }
 0x1be   :  { %v2364_v47 = vpop.f32.mrf.mxu0 }
 0x1ce   :  { %v2375_v48 = vpop.f32.mrf.mxu1 }
 0x1cf   :  { %v2376_v0 = vadd.f32 %v2375_v48, %v2363_v22 }
 0x1d6   :  { %v2377_v54 = vpop.f32.mrf.mxu1 }
 0x1f2   :  { %v2388_v62 = vpop.f32.mrf.mxu2 }
 0x1f3   :  { %v2389_v1 = vadd.f32 %v2388_v62, %v2376_v0 }
 0x1fa   :  { %v2390_v63 = vpop.f32.mrf.mxu2 }
 0x20e   :  { %v2401_v3 = vpop.f32.mrf.mxu3 }
 0x20f   :  { %v2402_v6 = vadd.f32 %v2401_v3, %v2389_v1 }
 0x211   :  { %v2405_v8 = vmax.f32 %v2402_v6, 0.0 }
 0x213   :  { %v2406_v9 = vpack.c.bf16 %v2405_v8, %v2405_v8 }
 0x215   :  { %3629 = vmatmul.msk.bf16.vlgmr.msra.gmra.mxu3 %vm2463_vm5, %v2406_v9 }
 0x216   :  { %v2403_v26 = vpop.f32.mrf.mxu3 }
 0x298   :  { %v2479_v4 = vpop.f32.mrf.mxu3 }
 0x299   :  { %v2480_v7 = vadd.f32 %v3911_v11, %v2479_v4 }
 0x29b   :  { %v3630_v12 = vmul.f32 -1.442695, %v2480_v7 }
 0x29d   :  { %3912 = vpow2.f32 %v3630_v12 }
 0x2a0   :  { %v2481_v13 = vpop.f32.mrf.mxu3 }
 0x2a3   :  { %v3913_v14 = vpop.eup %3912 }
 0x2a4   :  { %v2486_v36 = vadd.f32 1.0, %v3913_v14 }
 0x2a6   :  { %3914 = vrcp.f32 %v2486_v36  ;;  %v2498_v17 = vand.u32 2147483648, %v2486_v36  ;;  %v2496_v19 = vand.u32 2147483647, %v2486_v36  ;;  %vm2492_vm7 = vweird.f32 %v2486_v36 }
 0x2a8   :  { %v2499_v21 = vor.u32 1.1754944e-38, %v2498_v17  ;;  %vm2497_vm10 = vcmp.eq.f32.partialorder %v2496_v19, 8.507059e+37 }
 0x2ac   :  { %v3915_v15 = vpop.eup %3914 }
 0x2ad   :  { %v2488_v16 = vmul.f32 %v3915_v15, %v2486_v36  ;;  %vm2493_vm6 = vweird.f32 %v3915_v15 }
 0x2ae   :  { %vm2494_vm8 = vmor %vm2492_vm7, %vm2493_vm6 }
 0x2af   :  { %v2489_v45 = vsub.f32 1.0, %v2488_v16 }
 0x2b1   :  { %v2490_v56 = vmul.f32 %v3915_v15, %v2489_v45 }
 0x2b3   :  { %v2491_v20 = vadd.f32 %v3915_v15, %v2490_v56 }
 0x2b5   :  { %v2495_v27 = vsel %vm2494_vm8, %v3915_v15, %v2491_v20 }
 0x2b6   :  { %v2500_v23 = vsel %vm2497_vm10, %v2499_v21, %v2495_v27 }
 0x2b7   :  { %2503 = vst.msk [vmem:[%s5603_s7] sm:$0xff] %vm2502_vm9, %v2500_v23 }

</bundles_post_ra>
